<compile_context>
chip_gen: v7x
topology: tpu7x:2x2x1
jax: 0.10.0
libtpu: 0.0.40
codegen_flags: <defaults>
</compile_context>

<pallas_src>
import functools
import math

import jax
import jax.numpy as jnp
from jax.experimental import pallas as pl
from jax.experimental.pallas import tpu as pltpu

# ----------------------------- architecture -----------------------------
LAYERS = [2, 128, 20, 20, 20]          # trunk
LAYERS_HEAD = [20, 20, 20, 1]          # each of u / v / p

IN_PAD = 8            # x feature dim padded to one sublane group
ONES_ROW = 2          # homogeneous-coordinate ("ones") row inside the padded input
NUM_SPLITS = 2        # independent column half-tiles per grid step
TANH1 = math.tanh(1.0)


def _pad8(n):
    return (n + 7) // 8 * 8


def _device_kind():
    try:
        return jax.devices()[0].device_kind.lower()
    except Exception:
        return ""


def default_tile_n():
    """Batch columns per grid step.

    Single-TC chips (v5e/v6e): 2048 halves the ~0.35us/step overhead.
    Multi-TC chips (v7x, v4/v5p): keep 1024 so the grid stays >= 2 steps/core.
    """
    kind = _device_kind()
    if any(t in kind for t in ("v5 lite", "v5e", "v6")) and "v5p" not in kind:
        return 2048
    return 1024


def bf16_eup_ok():
    """bf16 tanh only on v6e/v7x (v5e and older have no bf16 VPU/EUP path)."""
    kind = _device_kind()
    if not kind:
        return False
    return not any(t in kind for t in ("v2", "v3", "v4", "v5"))


# ----------------------------- parameter init ---------------------------
def init_mlp(key, layer_sizes):
    """[(W, b), ...] with W (in, out) (PyTorch weight transposed), b (out,)."""
    params = []
    for i in range(len(layer_sizes) - 1):
        key, kw, kb = jax.random.split(key, 3)
        fan_in, fan_out = layer_sizes[i], layer_sizes[i + 1]
        bound = (6.0 / (fan_in + fan_out)) ** 0.5       # xavier_uniform
        w = jax.random.uniform(kw, (fan_in, fan_out), jnp.float32, -bound, bound)
        bb = 1.0 / (fan_in ** 0.5)                      # PyTorch default bias init
        b = jax.random.uniform(kb, (fan_out,), jnp.float32, -bb, bb)
        params.append((w, b))
    return params, key


# ----------------------------- head fusion & packing ---------------------
def _block_diag3(a, b, c):
    ra, ca = a.shape
    rb, cb = b.shape
    rc, cc = c.shape
    out = jnp.zeros((ra + rb + rc, ca + cb + cc), a.dtype)
    out = out.at[:ra, :ca].set(a)
    out = out.at[ra:ra + rb, ca:ca + cb].set(b)
    out = out.at[ra + rb:, ca + cb:].set(c)
    return out


def fuse_params(p_trunk, p_u, p_v, p_p):
    """Fuse trunk + 3 heads into one MLP.

    Returns (layers, tanh_flags); layers is a list of (W^T (out,in), b (out,)).
    Output rows of the final layer are ordered [u, v, p].
    """
    layers = [(w.T, b) for (w, b) in p_trunk]
    tanh = [i < len(p_trunk) - 1 for i in range(len(p_trunk))]

    # head layer 0: stack the three (20, 20) weights along the output axis
    (wu, bu), (wv, bv), (wp, bp) = p_u[0], p_v[0], p_p[0]
    layers.append((jnp.concatenate([wu, wv, wp], axis=1).T,
                   jnp.concatenate([bu, bv, bp])))
    # head layers 1..: block-diagonal (padding is exactly zero -> no leakage)
    for li in range(1, len(p_u)):
        (wu, bu), (wv, bv), (wp, bp) = p_u[li], p_v[li], p_p[li]
        layers.append((_block_diag3(wu, wv, wp).T,
                       jnp.concatenate([bu, bv, bp])))
    tanh += [i < len(p_u) - 1 for i in range(len(p_u))]
    return layers, tanh


def pack_params(fused_layers, tanh_flags, dtype=jnp.float32):
    """Pack all fused layers AND their biases into ONE weight slab.

    A homogeneous constant row is carried through the activations: the padded
    input has a ones row; every non-final layer gets an extra constant-generator
    output row (single entry 1/const) so the constant survives tanh as tanh(1),
    and its bias becomes an extra weight column scaled by 1/const.  The kernel
    is then a pure matmul(+tanh) chain with no bias adds or lane broadcasts.
    Zero padding of rows/cols stays exactly zero (tanh(0)=0), so the fused-head
    block-diagonal structure does not leak between u/v/p.

    Returns (W_slab, layout); layout = ((row_off, out_rows, in_cols, tanh), ...)
    with static Python ints/bools.
    """
    n = len(fused_layers)
    layout, meta = [], []
    roff = 0
    prev_cols = IN_PAD
    const_col, const_val = ONES_ROW, 1.0
    for l, (wt, b) in enumerate(fused_layers):
        o, i = wt.shape
        act = bool(tanh_flags[l])
        last = l == n - 1
        rows = o if last else o + 1                      # +1 constant-generator row
        rows_pad = rows if last else _pad8(rows)
        layout.append((roff, rows_pad, prev_cols, act))
        meta.append((roff, o, i, const_col, const_val, last))
        const_col, const_val = o, (TANH1 if act else 1.0)
        roff, prev_cols = roff + rows_pad, rows_pad

    total_rows = _pad8(roff)
    slab_w = max(ic for (_, _, ic, _) in layout)
    W = jnp.zeros((total_rows, slab_w), jnp.float32)
    for (wt, b), (ro, o, i, ccol, cval, last) in zip(fused_layers, meta):
        W = W.at[ro:ro + o, :i].set(wt)                  # W^T (out, in)
        W = W.at[ro:ro + o, ccol].set(b / cval)          # folded bias column
        if not last:
            W = W.at[ro + o, ccol].set(1.0 / cval)       # regenerate the constant
    return W.astype(dtype), tuple(layout)


# ----------------------------- kernel ------------------------------------
def dnn_kernel(layout, n_splits, act_dtype, x_ref, w_ref, out_ref):
    """Feature-major fused MLP: activations are (features, columns).

    Every layer (including the K=8 padded input layer) is a single MXU matmul;
    biases are pre-folded into the slab.  The tile is split into `n_splits`
    independent column groups so one group's matmul can overlap the other's
    tanh (EUP) in the scheduler.
    """
    cdt = w_ref.dtype                                    # MXU operand dtype
    tile = out_ref.shape[-1]
    cols = tile // n_splits
    hs = [x_ref[:, j * cols:(j + 1) * cols].astype(cdt) for j in range(n_splits)]

    n_layers = len(layout)
    for l, (roff, o, i, act) in enumerate(layout):
        w = w_ref[roff:roff + o, 0:i]                    # (o, i), zero padded
        last = l == n_layers - 1
        for j in range(n_splits):
            y = jnp.dot(w, hs[j], preferred_element_type=jnp.float32)
            if last:
                hs[j] = y
            elif act:
                hs[j] = jnp.tanh(y.astype(act_dtype)).astype(cdt)
            else:
                hs[j] = y.astype(cdt)

    for j in range(n_splits):                            # lane-dense (3, cols) stores
        out_ref[:, j * cols:(j + 1) * cols] = hs[j].astype(out_ref.dtype)


# ----------------------------- wrappers ------------------------------------
def dnn_forward_fm(xt, w_packed, layout, *, tile_n, act_dtype=jnp.float32):
    """Feature-major entry point: xt (IN_PAD, Np) -> (3, Np) = [u; v; p]."""
    in_pad, Np = xt.shape
    assert in_pad == IN_PAD
    assert Np % tile_n == 0
    assert tile_n % (NUM_SPLITS * 128) == 0
    n_tiles = Np // tile_n

    kernel = functools.partial(dnn_kernel, layout, NUM_SPLITS, act_dtype)
    return pl.pallas_call(
        kernel,
        out_shape=jax.ShapeDtypeStruct((3, Np), jnp.float32),
        grid_spec=pltpu.PrefetchScalarGridSpec(
            num_scalar_prefetch=0,
            grid=(n_tiles,),
            in_specs=[
                pl.BlockSpec((IN_PAD, tile_n), lambda i: (0, i)),
                pl.BlockSpec(w_packed.shape, lambda i: (0, 0)),
            ],
            out_specs=pl.BlockSpec((3, tile_n), lambda i: (0, i)),
        ),
        compiler_params=pltpu.CompilerParams(
            dimension_semantics=("parallel",),
            vmem_limit_bytes=32 * 1024 * 1024,
        ),
    )(xt, w_packed)


@functools.partial(jax.jit, static_argnames=("layout", "tile_n", "act_dtype"))
def dnn_forward(x, w_packed, *, layout, tile_n, act_dtype=jnp.float32):
    """Batch-major convenience wrapper: x (N, 2) -> (N, 3) = [u, v, p].

    The pad/transpose shims and the kernel run inside one jitted XLA program.
    """
    N = x.shape[0]
    Np = ((N + tile_n - 1) // tile_n) * tile_n
    xt = jnp.zeros((IN_PAD, Np), jnp.float32)
    xt = xt.at[:2, :N].set(x.T.astype(jnp.float32))
    xt = xt.at[ONES_ROW, :N].set(1.0)                    # homogeneous-coordinate row
    out_t = dnn_forward_fm(xt, w_packed, layout, tile_n=tile_n, act_dtype=act_dtype)
    return out_t[:, :N].T


# ----------------------------- pure-JAX reference --------------------------
def mlp_ref(h, params):
    n = len(params)
    for i, (w, b) in enumerate(params):
        h = h @ w + b
        if i < n - 1:
            h = jnp.tanh(h)
    return h


def dnn_ref(x, p_trunk, p_u, p_v, p_p):
    h = mlp_ref(x, p_trunk)
    return jnp.concatenate(
        [mlp_ref(h, p_u), mlp_ref(h, p_v), mlp_ref(h, p_p)], axis=1)


# ----------------------------- main ----------------------------------------
if __name__ == "__main__":
    key = jax.random.PRNGKey(0)

    p_trunk, key = init_mlp(key, LAYERS)
    p_u, key = init_mlp(key, LAYERS_HEAD)
    p_v, key = init_mlp(key, LAYERS_HEAD)
    p_p, key = init_mlp(key, LAYERS_HEAD)

    fused, tanh_flags = fuse_params(p_trunk, p_u, p_v, p_p)
    w_f32, layout = pack_params(fused, tanh_flags, dtype=jnp.float32)

    tile_n = default_tile_n()

    # deterministic input: N collocation points with (x, y) coordinates
    N = 4096
    key, kx = jax.random.split(key)
    x = jax.random.uniform(kx, (N, 2), jnp.float32, 0.0, 2.0)

    ref = dnn_ref(x, p_trunk, p_u, p_v, p_p)

    # --- default f32-MXU path (matches the f32 reference tightly) ----------
    out = dnn_forward(x, w_f32, layout=layout, tile_n=tile_n)
    out = jax.block_until_ready(out)
    assert out.shape == (N, 3)
    err = float(jnp.max(jnp.abs(out - ref)))
    assert err < 1e-3, f"f32 path mismatch vs pure-JAX reference: {err}"

    # --- bf16-MXU path (perf-review option; looser tolerance) --------------
    w_bf16 = w_f32.astype(jnp.bfloat16)
    act_dt = jnp.bfloat16 if bf16_eup_ok() else jnp.float32   # f32 tanh on v5e
    out_b = dnn_forward(x, w_bf16, layout=layout, tile_n=tile_n, act_dtype=act_dt)
    out_b = jax.block_until_ready(out_b)
    err_b = float(jnp.max(jnp.abs(out_b - ref)))
    assert err_b < 5e-2, f"bf16 path mismatch vs pure-JAX reference: {err_b}"

    print("KERNEL_OK")
</pallas_src>

<mosaic_0001>
module attributes {stable_mosaic.version = 11 : i64} {
  func.func @dnn_kernel(%arg0: i32, %arg1: memref<8x1024xf32, #tpu.memory_space<vmem>>, %arg2: memref<344x136xf32, #tpu.memory_space<vmem>>, %arg3: memref<3x1024xf32, #tpu.memory_space<vmem>>) attributes {dimension_semantics = [#tpu.dimension_semantics<parallel>], iteration_bounds = array<i64: 4>, scalar_prefetch = 0 : i64, scratch_operands = 0 : i64, tpu.core_type = #tpu.core_type<tc>, window_params = [{transform_indices = @transform_0, window_bounds = array<i64: 8, 1024>}, {pipeline_mode = #tpu.pipeline_mode<synchronous>, transform_indices = @transform_1, window_bounds = array<i64: 344, 136>}, {transform_indices = @transform_2, window_bounds = array<i64: 3, 1024>}]} {
    %c0 = arith.constant 0 : index
    %c0_0 = arith.constant 0 : index
    %0 = vector.load %arg1[%c0, %c0_0] : memref<8x1024xf32, #tpu.memory_space<vmem>>, vector<8x512xf32>
    %c0_1 = arith.constant 0 : index
    %c512 = arith.constant 512 : index
    %1 = vector.load %arg1[%c0_1, %c512] : memref<8x1024xf32, #tpu.memory_space<vmem>>, vector<8x512xf32>
    %c0_2 = arith.constant 0 : index
    %c0_3 = arith.constant 0 : index
    %2 = vector.load %arg2[%c0_2, %c0_3] : memref<344x136xf32, #tpu.memory_space<vmem>>, vector<136x8xf32>
    %cst = arith.constant dense<0.000000e+00> : vector<136x512xf32>
    %3 = tpu.matmul %2, %0, %cst {dimension_numbers = #tpu.dot_dimension_numbers<[1], [0], [0], [1], [0, 0, 1, 1], [], []>} : vector<136x8xf32>, vector<8x512xf32>, vector<136x512xf32> -> vector<136x512xf32>
    %4 = math.tanh %3 : vector<136x512xf32>
    %cst_4 = arith.constant dense<0.000000e+00> : vector<136x512xf32>
    %5 = tpu.matmul %2, %1, %cst_4 {dimension_numbers = #tpu.dot_dimension_numbers<[1], [0], [0], [1], [0, 0, 1, 1], [], []>} : vector<136x8xf32>, vector<8x512xf32>, vector<136x512xf32> -> vector<136x512xf32>
    %6 = math.tanh %5 : vector<136x512xf32>
    %c136 = arith.constant 136 : index
    %c0_5 = arith.constant 0 : index
    %7 = vector.load %arg2[%c136, %c0_5] : memref<344x136xf32, #tpu.memory_space<vmem>>, vector<24x136xf32>
    %cst_6 = arith.constant dense<0.000000e+00> : vector<24x512xf32>
    %8 = tpu.matmul %7, %4, %cst_6 {dimension_numbers = #tpu.dot_dimension_numbers<[1], [0], [0], [1], [0, 0, 1, 1], [], []>} : vector<24x136xf32>, vector<136x512xf32>, vector<24x512xf32> -> vector<24x512xf32>
    %9 = math.tanh %8 : vector<24x512xf32>
    %cst_7 = arith.constant dense<0.000000e+00> : vector<24x512xf32>
    %10 = tpu.matmul %7, %6, %cst_7 {dimension_numbers = #tpu.dot_dimension_numbers<[1], [0], [0], [1], [0, 0, 1, 1], [], []>} : vector<24x136xf32>, vector<136x512xf32>, vector<24x512xf32> -> vector<24x512xf32>
    %11 = math.tanh %10 : vector<24x512xf32>
    %c160 = arith.constant 160 : index
    %c0_8 = arith.constant 0 : index
    %12 = vector.load %arg2[%c160, %c0_8] : memref<344x136xf32, #tpu.memory_space<vmem>>, vector<24x24xf32>
    %cst_9 = arith.constant dense<0.000000e+00> : vector<24x512xf32>
    %13 = tpu.matmul %12, %9, %cst_9 {dimension_numbers = #tpu.dot_dimension_numbers<[1], [0], [0], [1], [0, 0, 1, 1], [], []>} : vector<24x24xf32>, vector<24x512xf32>, vector<24x512xf32> -> vector<24x512xf32>
    %14 = math.tanh %13 : vector<24x512xf32>
    %cst_10 = arith.constant dense<0.000000e+00> : vector<24x512xf32>
    %15 = tpu.matmul %12, %11, %cst_10 {dimension_numbers = #tpu.dot_dimension_numbers<[1], [0], [0], [1], [0, 0, 1, 1], [], []>} : vector<24x24xf32>, vector<24x512xf32>, vector<24x512xf32> -> vector<24x512xf32>
    %16 = math.tanh %15 : vector<24x512xf32>
    %c184 = arith.constant 184 : index
    %c0_11 = arith.constant 0 : index
    %17 = vector.load %arg2[%c184, %c0_11] : memref<344x136xf32, #tpu.memory_space<vmem>>, vector<24x24xf32>
    %cst_12 = arith.constant dense<0.000000e+00> : vector<24x512xf32>
    %18 = tpu.matmul %17, %14, %cst_12 {dimension_numbers = #tpu.dot_dimension_numbers<[1], [0], [0], [1], [0, 0, 1, 1], [], []>} : vector<24x24xf32>, vector<24x512xf32>, vector<24x512xf32> -> vector<24x512xf32>
    %cst_13 = arith.constant dense<0.000000e+00> : vector<24x512xf32>
    %19 = tpu.matmul %17, %16, %cst_13 {dimension_numbers = #tpu.dot_dimension_numbers<[1], [0], [0], [1], [0, 0, 1, 1], [], []>} : vector<24x24xf32>, vector<24x512xf32>, vector<24x512xf32> -> vector<24x512xf32>
    %c208 = arith.constant 208 : index
    %c0_14 = arith.constant 0 : index
    %20 = vector.load %arg2[%c208, %c0_14] : memref<344x136xf32, #tpu.memory_space<vmem>>, vector<64x24xf32>
    %cst_15 = arith.constant dense<0.000000e+00> : vector<64x512xf32>
    %21 = tpu.matmul %20, %18, %cst_15 {dimension_numbers = #tpu.dot_dimension_numbers<[1], [0], [0], [1], [0, 0, 1, 1], [], []>} : vector<64x24xf32>, vector<24x512xf32>, vector<64x512xf32> -> vector<64x512xf32>
    %22 = math.tanh %21 : vector<64x512xf32>
    %cst_16 = arith.constant dense<0.000000e+00> : vector<64x512xf32>
    %23 = tpu.matmul %20, %19, %cst_16 {dimension_numbers = #tpu.dot_dimension_numbers<[1], [0], [0], [1], [0, 0, 1, 1], [], []>} : vector<64x24xf32>, vector<24x512xf32>, vector<64x512xf32> -> vector<64x512xf32>
    %24 = math.tanh %23 : vector<64x512xf32>
    %c272 = arith.constant 272 : index
    %c0_17 = arith.constant 0 : index
    %25 = vector.load %arg2[%c272, %c0_17] : memref<344x136xf32, #tpu.memory_space<vmem>>, vector<64x64xf32>
    %cst_18 = arith.constant dense<0.000000e+00> : vector<64x512xf32>
    %26 = tpu.matmul %25, %22, %cst_18 {dimension_numbers = #tpu.dot_dimension_numbers<[1], [0], [0], [1], [0, 0, 1, 1], [], []>} : vector<64x64xf32>, vector<64x512xf32>, vector<64x512xf32> -> vector<64x512xf32>
    %27 = math.tanh %26 : vector<64x512xf32>
    %cst_19 = arith.constant dense<0.000000e+00> : vector<64x512xf32>
    %28 = tpu.matmul %25, %24, %cst_19 {dimension_numbers = #tpu.dot_dimension_numbers<[1], [0], [0], [1], [0, 0, 1, 1], [], []>} : vector<64x64xf32>, vector<64x512xf32>, vector<64x512xf32> -> vector<64x512xf32>
    %29 = math.tanh %28 : vector<64x512xf32>
    %c336 = arith.constant 336 : index
    %c0_20 = arith.constant 0 : index
    %30 = vector.load %arg2[%c336, %c0_20] : memref<344x136xf32, #tpu.memory_space<vmem>>, vector<3x64xf32>
    %cst_21 = arith.constant dense<0.000000e+00> : vector<3x512xf32>
    %31 = tpu.matmul %30, %27, %cst_21 {dimension_numbers = #tpu.dot_dimension_numbers<[1], [0], [0], [1], [0, 0, 1, 1], [], []>} : vector<3x64xf32>, vector<64x512xf32>, vector<3x512xf32> -> vector<3x512xf32>
    %cst_22 = arith.constant dense<0.000000e+00> : vector<3x512xf32>
    %32 = tpu.matmul %30, %29, %cst_22 {dimension_numbers = #tpu.dot_dimension_numbers<[1], [0], [0], [1], [0, 0, 1, 1], [], []>} : vector<3x64xf32>, vector<64x512xf32>, vector<3x512xf32> -> vector<3x512xf32>
    %c0_23 = arith.constant 0 : index
    %c0_24 = arith.constant 0 : index
    %33 = vector.load %arg3[%c0_23, %c0_24] : memref<3x1024xf32, #tpu.memory_space<vmem>>, vector<3x512xf32>
    tpu.vector_store %arg3[%c0_23, %c0_24], %31 {strides = array<i32>} : memref<3x1024xf32, #tpu.memory_space<vmem>>, vector<3x512xf32>,
    %c0_25 = arith.constant 0 : index
    %c512_26 = arith.constant 512 : index
    %34 = vector.load %arg3[%c0_25, %c512_26] : memref<3x1024xf32, #tpu.memory_space<vmem>>, vector<3x512xf32>
    tpu.vector_store %arg3[%c0_25, %c512_26], %32 {strides = array<i32>} : memref<3x1024xf32, #tpu.memory_space<vmem>>, vector<3x512xf32>,
    return
  }
  func.func @transform_0(%arg0: i32) -> (i32, i32) {
    %c0_i32 = arith.constant 0 : i32
    %c0_i32_0 = arith.constant 0 : i32
    return %c0_i32, %arg0 : i32, i32
  }
  func.func @transform_1(%arg0: i32) -> (i32, i32) {
    %c0_i32 = arith.constant 0 : i32
    %c0_i32_0 = arith.constant 0 : i32
    %c0_i32_1 = arith.constant 0 : i32
    return %c0_i32, %c0_i32_0 : i32, i32
  }
  func.func @transform_2(%arg0: i32) -> (i32, i32) {
    %c0_i32 = arith.constant 0 : i32
    %c0_i32_0 = arith.constant 0 : i32
    return %c0_i32, %arg0 : i32, i32
  }
}

</mosaic_0001>

<bundles_post_ra>
// kernel: dnn_forward.1
= control target key start
LH: loop header
LB: loop body
LE: loop exit
PB: predicated region body
PF: predicated region fallthrough
CT: control target
= control target key end

     0   :  { %7 = vsyncpa [#allocation3], 0  ;;  %s5644_s0 = inlined_call_operand.vmem [shape: f32[8,4096], index: 0, kind: input, shape index: {}]   ;;  %s5645_s1 = inlined_call_operand.vmem [shape: f32[344,136], index: 1, kind: input, shape index: {}]   ;;  %s5646_s2 = inlined_call_operand.hbm [shape: f32[3,4096], index: 2, kind: output, shape index: {}]  }
   0x1   :  { %9 = vsyncpa [#allocation3 + $0x1], 0  ;;  %s4823_s9 = smov 0   ;;  %s4825_s10 = smov 0  }
   0x2   :  { %s4827_s11 = smov 0   ;;  %s4829_s12 = smov 0  }
   0x3 LB: > { %s4844_s13 = sadd.s32 4294967295, %s4804_s12   ;;  %s3589_s14 = sadd.s32 4294967294, %s4804_s12   ;;  %s4804_s12 = sphi %s4829_s12, %s5652_s12   ;;  %s4800_s11 = sphi %s4827_s11, %s5651_s11   ;;  %s4796_s10 = sphi %s4825_s10, %s5650_s10   ;;  %s4792_s9 = sphi %s4823_s9, %s5649_s9  }
   0x4   : > { %s4848_s15 = sadd.s32 1, %s4804_s12   ;;  %s69_s16 = sadd.s32 1, %s4800_s11 }
   0x5   : > { %s66_s17 = ssub.s32 %s4804_s12, %s4848_s15  ;;  %p79_p0 = scmp.ne.s32.totalorder %s4800_s11, %s4796_s10 }
   0x6   : > { %p67_p1 = scmp.eq.s32.totalorder %s66_s17, 0  ;;  %p80_p2 = scmp.eq.s32.totalorder %s4844_s13, 3 }
   0x7   : > { %p85_p3 = scmp.ne.s32.totalorder %s4796_s10, %s4792_s9  ;;  %p86_p4 = scmp.eq.s32.totalorder %s3589_s14, 3 }
   0x8   : > { %s4859_s18 = scalar_select %p67_p1, %s4800_s11, %s69_s16  }
   0x9   : > { %p4861_p5 = por %p80_p2, %p79_p0  ;;  %p4865_p6 = por %p86_p4, %p85_p3 }
   0xa   : > { %p3592_p7 = scmp.ge.s32.totalorder %s4804_s12, 1  ;;  %p116_p8 = scmp.lt.s32.totalorder %s4804_s12, 5 }
   0xc   : > { %p117_p9 = pnand %p3592_p7, %p116_p8 }
   0xd   : > { %s3594_s21 = sshll.u32 (!%p117_p9), %s4844_s13, 3  ;;  %v4806_v0 = vmov (!%p117_p9), 0.0   ;;  %v4880_v1 = vld [vmem:[%s5645_s1] sm:$0xff] (!%p117_p9)  ;;  %vm170_vm0 = vcmask (!%p117_p9), 64512   ;;  %v4891_v10 = vld [vmem:[%s5645_s1 + $0x10] sm:$0xff] (!%p117_p9)  ;;  %v5167_v26 = vld [vmem:[%s5645_s1 + $0x118] sm:$0xff] (!%p117_p9) }
   0xe   : > { %120 = sbr.rel (%p117_p9) target bundleno = 1836 (0x72c), region = 28  ;;  %p139_p10 = scmp.lt.s32.totalorder (!%p117_p9), %s3594_s21, 31  ;;  %286 = vmatprep.mubr.f32.mxu0 (!%p117_p9), %v4806_v0  ;;  %453 = vmatprep.mubr.f32.mxu1 (!%p117_p9), %v4806_v0  ;;  %v4902_v11 = vld [vmem:[%s5645_s1 + $0x20] sm:$0xff] (!%p117_p9)  ;;  %v4913_v12 = vld [vmem:[%s5645_s1 + $0x30] sm:$0xff] (!%p117_p9)  ;;  %vm1400_vm1 = vcmask (!%p117_p9), 195584   ;;  %vm2666_vm2 = vcmask (!%p117_p9), 523264  }
   0xf   : > { %v4924_v13 = vld [vmem:[%s5645_s1 + $0x40] sm:$0xff] (!%p117_p9)  ;;  %v4935_v14 = vld [vmem:[%s5645_s1 + $0x50] sm:$0xff] (!%p117_p9)  ;;  %s135_s23 = sand.u32 (!%p117_p9), 1, %s4796_s10   ;;  %s3773_s26 = sshll.u32 (!%p117_p9), %s4844_s13, 9 }
  0x10   : > { %v4946_v15 = vld [vmem:[%s5645_s1 + $0x60] sm:$0xff] (!%p117_p9)  ;;  %v4957_v16 = vld [vmem:[%s5645_s1 + $0x70] sm:$0xff] (!%p117_p9)  ;;  %s3593_s24 = sshll.u32 (!%p117_p9), %s135_s23, 5  ;;  %s5602_s30 = scalar_lea.hbm (!%p117_p9), %s5646_s2, %s3773_s26 }
  0x11   : > { %v4968_v17 = vld [vmem:[%s5645_s1 + $0x80] sm:$0xff] (!%p117_p9)  ;;  %v4979_v18 = vld [vmem:[%s5645_s1 + $0x90] sm:$0xff] (!%p117_p9)  ;;  %s3516_s3 = scalar_lea.sflag (!%p117_p9), [#allocation3], %s135_s23  ;;  %s4807_s4 = smov (!%p117_p9), [#allocation2]  }
  0x12   : > { %v4990_v19 = vld [vmem:[%s5645_s1 + $0xa0] sm:$0xff] (!%p117_p9)  ;;  %v5001_v20 = vld [vmem:[%s5645_s1 + $0xb0] sm:$0xff] (!%p117_p9)  ;;  %s4746_s5 = sshll.u32 (!%p117_p9), %s4807_s4, 4  ;;  %s4747_s5 = int_to_ptr.vmem [resolvable:$false] %s4746_s5 }
  0x13   : > { %v5012_v21 = vld [vmem:[%s5645_s1 + $0xc0] sm:$0xff] (!%p117_p9)  ;;  %v5023_v22 = vld [vmem:[%s5645_s1 + $0xd0] sm:$0xff] (!%p117_p9)  ;;  %s4748_s6 = scalar_lea.vmem (!%p117_p9), %s4747_s5, 1024 }
  0x14   : > { %v5034_v23 = vld [vmem:[%s5645_s1 + $0xe0] sm:$0xff] (!%p117_p9)  ;;  %v5045_v24 = vld [vmem:[%s5645_s1 + $0xf0] sm:$0xff] (!%p117_p9) }
  0x15   : > { %s5654_s21 = smov (!%p139_p10, %s3594_s21), 31  ;;  %v5056_v25 = vld [vmem:[%s5645_s1 + $0x100] sm:$0xff] }
  0x16   : > { %s3595_s22 = sshll.u32 %s5654_s21, 3 }
  0x17   : > { %s142_s25 = scalar_lea.vmem %s5644_s0, %s3595_s22 }
  0x18   : > { %v146_v2 = vld [vmem:[%s142_s25 + $0x8] sm:$0xff]  ;;  %v148_v3 = vld [vmem:[%s142_s25 + $0x18] sm:$0xff]  ;;  %v145_v4 = vld [vmem:[%s142_s25] sm:$0xff] }
  0x19   : > { %222 = vmatprep.subr.mxu0 %v146_v2  ;;  %389 = vmatprep.subr.mxu1 %v148_v3  ;;  %v147_v5 = vld [vmem:[%s142_s25 + $0x10] sm:$0xff]  ;;  %v150_v6 = vld [vmem:[%s142_s25 + $0x28] sm:$0xff]  ;;  %v152_v7 = vld [vmem:[%s142_s25 + $0x38] sm:$0xff] }
  0x1a   : > { %223 = vmatpush1.msra.mxu0 %v145_v4  ;;  %390 = vmatpush1.msra.mxu1 %v147_v5  ;;  %v149_v8 = vld [vmem:[%s142_s25 + $0x20] sm:$0xff]  ;;  %v151_v9 = vld [vmem:[%s142_s25 + $0x30] sm:$0xff]  ;;  %s137_s25 = scalar_lea.vmem [#allocation2], %s3593_s24 }
  0x1b   : > { %3596 = vmatmul.mubr.msk.f32.vlgmr.msra.gmra.mrb[0].mxu0 %vm170_vm0, %v4880_v1  ;;  %3613 = vmatmul.mubr.msk.f32.vlgmr.msra.gmra.mrb[0].mxu1 %vm170_vm0, %v4880_v1  ;;  %s3530_s27 = sshll.u32 %s137_s25, 4  ;;  %s5604_s27 = int_to_ptr.vmem [resolvable:$true] %s3530_s27 }
  0x1c   : > { %292 = vmatprep.mubr.f32.mxu0 %v4806_v0  ;;  %459 = vmatprep.mubr.f32.mxu1 %v4806_v0  ;;  %s4742_s13 = scalar_lea.vmem %s5604_s27, 512  ;;  %p4749_p0 = scmp.lt.s32.totalorder %s5604_s27, %s4747_s5 }
  0x1d   : > { %624 = vmatprep.subr.mxu0 %v150_v6  ;;  %791 = vmatprep.subr.mxu1 %v152_v7  ;;  %p4743_p11 = scmp.ne.s32.totalorder %s5604_s27, %s4742_s13  ;;  %p4750_p1 = scmp.lt.s32.totalorder %s4748_s6, %s4742_s13 }
  0x1e   : > { %625 = vmatpush1.msra.mxu0 %v149_v8  ;;  %792 = vmatpush1.msra.mxu1 %v151_v9 }
  0x1f   : > { %3597 = vmatmul.mubr.msk.f32.gmra.mrb[2].mxu0 %vm170_vm0, %v4891_v10  ;;  %3614 = vmatmul.mubr.msk.f32.gmra.mrb[2].mxu1 %vm170_vm0, %v4891_v10  ;;  %p4744_p12 = pnand %p4743_p11, %p4861_p5  ;;  %p4751_p2 = por %p4750_p1, %p4749_p0 }
  0x20   : > { %298 = vmatprep.mubr.f32.mxu0 %v4806_v0  ;;  %465 = vmatprep.mubr.f32.mxu1 %v4806_v0 }
  0x21   : > { %p4745_p13 = pneg %p4744_p12 }
  0x23   : > { %3598 = vmatmul.mubr.msk.f32.gmra.mrb[4].mxu0 %vm170_vm0, %v4902_v11  ;;  %3615 = vmatmul.mubr.msk.f32.gmra.mrb[4].mxu1 %vm170_vm0, %v4902_v11  ;;  %p4752_p3 = pnand %p4751_p2, %p4745_p13 }
  0x24   : > { %304 = vmatprep.mubr.f32.mxu0 %v4806_v0  ;;  %471 = vmatprep.mubr.f32.mxu1 %v4806_v0 }
  0x27   : > { %3599 = vmatmul.mubr.msk.f32.gmra.mrb[6].mxu0 %vm170_vm0, %v4913_v12  ;;  %3616 = vmatmul.mubr.msk.f32.gmra.mrb[6].mxu1 %vm170_vm0, %v4913_v12 }
  0x28   : > { %310 = vmatprep.mubr.f32.mxu0 %v4806_v0  ;;  %477 = vmatprep.mubr.f32.mxu1 %v4806_v0 }
  0x2b   : > { %3600 = vmatmul.mubr.msk.f32.gmra.mrb[8].mxu0 %vm170_vm0, %v4924_v13  ;;  %3617 = vmatmul.mubr.msk.f32.gmra.mrb[8].mxu1 %vm170_vm0, %v4924_v13 }
  0x2c   : > { %316 = vmatprep.mubr.f32.mxu0 %v4806_v0  ;;  %483 = vmatprep.mubr.f32.mxu1 %v4806_v0 }
  0x2f   : > { %3601 = vmatmul.mubr.msk.f32.gmra.mrb[10].mxu0 %vm170_vm0, %v4935_v14  ;;  %3618 = vmatmul.mubr.msk.f32.gmra.mrb[10].mxu1 %vm170_vm0, %v4935_v14 }
  0x30   : > { %322 = vmatprep.mubr.f32.mxu0 %v4806_v0  ;;  %489 = vmatprep.mubr.f32.mxu1 %v4806_v0 }
  0x33   : > { %3602 = vmatmul.mubr.msk.f32.gmra.mrb[12].mxu0 %vm170_vm0, %v4946_v15  ;;  %3619 = vmatmul.mubr.msk.f32.gmra.mrb[12].mxu1 %vm170_vm0, %v4946_v15 }
  0x34   : > { %328 = vmatprep.mubr.f32.mxu0 %v4806_v0  ;;  %495 = vmatprep.mubr.f32.mxu1 %v4806_v0 }
  0x37   : > { %3603 = vmatmul.mubr.msk.f32.gmra.mrb[14].mxu0 %vm170_vm0, %v4957_v16  ;;  %3620 = vmatmul.mubr.msk.f32.gmra.mrb[14].mxu1 %vm170_vm0, %v4957_v16 }
  0x38   : > { %334 = vmatprep.mubr.f32.mxu0 %v4806_v0  ;;  %501 = vmatprep.mubr.f32.mxu1 %v4806_v0 }
  0x3b   : > { %3604 = vmatmul.mubr.msk.f32.gmra.mrb[16].mxu0 %vm170_vm0, %v4968_v17  ;;  %3621 = vmatmul.mubr.msk.f32.gmra.mrb[16].mxu1 %vm170_vm0, %v4968_v17 }
  0x3c   : > { %340 = vmatprep.mubr.f32.mxu0 %v4806_v0  ;;  %507 = vmatprep.mubr.f32.mxu1 %v4806_v0 }
  0x3f   : > { %3605 = vmatmul.mubr.msk.f32.gmra.mrb[18].mxu0 %vm170_vm0, %v4979_v18  ;;  %3622 = vmatmul.mubr.msk.f32.gmra.mrb[18].mxu1 %vm170_vm0, %v4979_v18 }
  0x40   : > { %346 = vmatprep.mubr.f32.mxu0 %v4806_v0  ;;  %513 = vmatprep.mubr.f32.mxu1 %v4806_v0 }
  0x43   : > { %3606 = vmatmul.mubr.msk.f32.gmra.mrb[20].mxu0 %vm170_vm0, %v4990_v19  ;;  %3623 = vmatmul.mubr.msk.f32.gmra.mrb[20].mxu1 %vm170_vm0, %v4990_v19 }
  0x44   : > { %352 = vmatprep.mubr.f32.mxu0 %v4806_v0  ;;  %519 = vmatprep.mubr.f32.mxu1 %v4806_v0 }
  0x47   : > { %3607 = vmatmul.mubr.msk.f32.gmra.mrb[22].mxu0 %vm170_vm0, %v5001_v20  ;;  %3624 = vmatmul.mubr.msk.f32.gmra.mrb[22].mxu1 %vm170_vm0, %v5001_v20 }
  0x48   : > { %358 = vmatprep.mubr.f32.mxu0 %v4806_v0  ;;  %525 = vmatprep.mubr.f32.mxu1 %v4806_v0 }
  0x4b   : > { %3608 = vmatmul.mubr.msk.f32.gmra.mrb[24].mxu0 %vm170_vm0, %v5012_v21  ;;  %3625 = vmatmul.mubr.msk.f32.gmra.mrb[24].mxu1 %vm170_vm0, %v5012_v21 }
  0x4c   : > { %364 = vmatprep.mubr.f32.mxu0 %v4806_v0  ;;  %531 = vmatprep.mubr.f32.mxu1 %v4806_v0 }
  0x4f   : > { %3609 = vmatmul.mubr.msk.f32.gmra.mrb[26].mxu0 %vm170_vm0, %v5023_v22  ;;  %3626 = vmatmul.mubr.msk.f32.gmra.mrb[26].mxu1 %vm170_vm0, %v5023_v22 }
  0x50   : > { %370 = vmatprep.mubr.f32.mxu0 %v4806_v0  ;;  %537 = vmatprep.mubr.f32.mxu1 %v4806_v0 }
  0x53   : > { %3610 = vmatmul.mubr.msk.f32.gmra.mrb[28].mxu0 %vm170_vm0, %v5034_v23  ;;  %3627 = vmatmul.mubr.msk.f32.gmra.mrb[28].mxu1 %vm170_vm0, %v5034_v23 }
  0x54   : > { %376 = vmatprep.mubr.f32.mxu0 %v4806_v0  ;;  %543 = vmatprep.mubr.f32.mxu1 %v4806_v0 }
  0x57   : > { %3611 = vmatmul.mubr.msk.f32.gmra.mrb[30].mxu0 %vm170_vm0, %v5045_v24  ;;  %3628 = vmatmul.mubr.msk.f32.gmra.mrb[30].mxu1 %vm170_vm0, %v5045_v24 }
  0x58   : > { %382 = vmatprep.mubr.f32.mxu0 %v4806_v0  ;;  %549 = vmatprep.mubr.f32.mxu1 %v4806_v0 }
  0x5b   : > { %3612 = vmatmul.mubr.msk.f32.gmra.mrb[32].mxu0 %vm170_vm0, %v5056_v25  ;;  %3629 = vmatmul.mubr.msk.f32.gmra.mrb[32].mxu1 %vm170_vm0, %v5056_v25 }
  0x5c   : > { %688 = vmatprep.mubr.f32.mxu0 %v4806_v0  ;;  %855 = vmatprep.mubr.f32.mxu1 %v4806_v0 }
  0x5f   : > { %3630 = vmatmul.mubr.msk.f32.vlgmr.msra.gmra.mrb[34].mxu0 %vm170_vm0, %v4880_v1  ;;  %3647 = vmatmul.mubr.msk.f32.vlgmr.msra.gmra.mrb[34].mxu1 %vm170_vm0, %v4880_v1 }
  0x60   : > { %694 = vmatprep.mubr.f32.mxu0 %v4806_v0  ;;  %861 = vmatprep.mubr.f32.mxu1 %v4806_v0 }
  0x63   : > { %3631 = vmatmul.mubr.msk.f32.gmra.mrb[36].mxu0 %vm170_vm0, %v4891_v10  ;;  %3648 = vmatmul.mubr.msk.f32.gmra.mrb[36].mxu1 %vm170_vm0, %v4891_v10 }
  0x64   : > { %700 = vmatprep.mubr.f32.mxu0 %v4806_v0  ;;  %867 = vmatprep.mubr.f32.mxu1 %v4806_v0 }
  0x67   : > { %3632 = vmatmul.mubr.msk.f32.gmra.mrb[38].mxu0 %vm170_vm0, %v4902_v11  ;;  %3649 = vmatmul.mubr.msk.f32.gmra.mrb[38].mxu1 %vm170_vm0, %v4902_v11 }
  0x68   : > { %706 = vmatprep.mubr.f32.mxu0 %v4806_v0  ;;  %873 = vmatprep.mubr.f32.mxu1 %v4806_v0 }
  0x6b   : > { %3633 = vmatmul.mubr.msk.f32.gmra.mrb[40].mxu0 %vm170_vm0, %v4913_v12  ;;  %3650 = vmatmul.mubr.msk.f32.gmra.mrb[40].mxu1 %vm170_vm0, %v4913_v12 }
  0x6c   : > { %712 = vmatprep.mubr.f32.mxu0 %v4806_v0  ;;  %879 = vmatprep.mubr.f32.mxu1 %v4806_v0 }
  0x6f   : > { %3634 = vmatmul.mubr.msk.f32.gmra.mrb[42].mxu0 %vm170_vm0, %v4924_v13  ;;  %3651 = vmatmul.mubr.msk.f32.gmra.mrb[42].mxu1 %vm170_vm0, %v4924_v13 }
  0x70   : > { %718 = vmatprep.mubr.f32.mxu0 %v4806_v0  ;;  %885 = vmatprep.mubr.f32.mxu1 %v4806_v0 }
  0x73   : > { %3635 = vmatmul.mubr.msk.f32.gmra.mrb[44].mxu0 %vm170_vm0, %v4935_v14  ;;  %3652 = vmatmul.mubr.msk.f32.gmra.mrb[44].mxu1 %vm170_vm0, %v4935_v14 }
  0x74   : > { %724 = vmatprep.mubr.f32.mxu0 %v4806_v0  ;;  %891 = vmatprep.mubr.f32.mxu1 %v4806_v0 }
  0x77   : > { %3636 = vmatmul.mubr.msk.f32.gmra.mrb[46].mxu0 %vm170_vm0, %v4946_v15  ;;  %3653 = vmatmul.mubr.msk.f32.gmra.mrb[46].mxu1 %vm170_vm0, %v4946_v15 }
  0x78   : > { %730 = vmatprep.mubr.f32.mxu0 %v4806_v0  ;;  %897 = vmatprep.mubr.f32.mxu1 %v4806_v0 }
  0x7b   : > { %3637 = vmatmul.mubr.msk.f32.gmra.mrb[48].mxu0 %vm170_vm0, %v4957_v16  ;;  %3654 = vmatmul.mubr.msk.f32.gmra.mrb[48].mxu1 %vm170_vm0, %v4957_v16 }
  0x7c   : > { %736 = vmatprep.mubr.f32.mxu0 %v4806_v0  ;;  %903 = vmatprep.mubr.f32.mxu1 %v4806_v0 }
  0x7f   : > { %3638 = vmatmul.mubr.msk.f32.gmra.mrb[50].mxu0 %vm170_vm0, %v4968_v17  ;;  %3655 = vmatmul.mubr.msk.f32.gmra.mrb[50].mxu1 %vm170_vm0, %v4968_v17 }
  0x80   : > { %742 = vmatprep.mubr.f32.mxu0 %v4806_v0  ;;  %909 = vmatprep.mubr.f32.mxu1 %v4806_v0 }
  0x83   : > { %3639 = vmatmul.mubr.msk.f32.gmra.mrb[52].mxu0 %vm170_vm0, %v4979_v18  ;;  %3656 = vmatmul.mubr.msk.f32.gmra.mrb[52].mxu1 %vm170_vm0, %v4979_v18 }
  0x84   : > { %748 = vmatprep.mubr.f32.mxu0 %v4806_v0  ;;  %915 = vmatprep.mubr.f32.mxu1 %v4806_v0 }
  0x87   : > { %3640 = vmatmul.mubr.msk.f32.gmra.mrb[54].mxu0 %vm170_vm0, %v4990_v19  ;;  %3657 = vmatmul.mubr.msk.f32.gmra.mrb[54].mxu1 %vm170_vm0, %v4990_v19 }
  0x88   : > { %754 = vmatprep.mubr.f32.mxu0 %v4806_v0  ;;  %921 = vmatprep.mubr.f32.mxu1 %v4806_v0 }
  0x8b   : > { %3641 = vmatmul.mubr.msk.f32.gmra.mrb[56].mxu0 %vm170_vm0, %v5001_v20  ;;  %3658 = vmatmul.mubr.msk.f32.gmra.mrb[56].mxu1 %vm170_vm0, %v5001_v20 }
  0x8c   : > { %760 = vmatprep.mubr.f32.mxu0 %v4806_v0  ;;  %927 = vmatprep.mubr.f32.mxu1 %v4806_v0 }
  0x8f   : > { %3642 = vmatmul.mubr.msk.f32.gmra.mrb[58].mxu0 %vm170_vm0, %v5012_v21  ;;  %3659 = vmatmul.mubr.msk.f32.gmra.mrb[58].mxu1 %vm170_vm0, %v5012_v21 }
  0x90   : > { %766 = vmatprep.mubr.f32.mxu0 %v4806_v0  ;;  %933 = vmatprep.mubr.f32.mxu1 %v4806_v0 }
  0x93   : > { %3643 = vmatmul.mubr.msk.f32.gmra.mrb[60].mxu0 %vm170_vm0, %v5023_v22  ;;  %3660 = vmatmul.mubr.msk.f32.gmra.mrb[60].mxu1 %vm170_vm0, %v5023_v22 }
  0x94   : > { %772 = vmatprep.mubr.f32.mxu0 %v4806_v0  ;;  %939 = vmatprep.mubr.f32.mxu1 %v4806_v0 }
  0x97   : > { %3644 = vmatmul.mubr.msk.f32.gmra.mrb[62].mxu0 %vm170_vm0, %v5034_v23  ;;  %3661 = vmatmul.mubr.msk.f32.gmra.mrb[62].mxu1 %vm170_vm0, %v5034_v23 }
  0x98   : > { %778 = vmatprep.mubr.f32.mxu0 %v4806_v0  ;;  %945 = vmatprep.mubr.f32.mxu1 %v4806_v0 }
  0x9b   : > { %3645 = vmatmul.mubr.msk.f32.gmra.mrb[64].mxu0 %vm170_vm0, %v5045_v24  ;;  %3662 = vmatmul.mubr.msk.f32.gmra.mrb[64].mxu1 %vm170_vm0, %v5045_v24 }
  0x9c   : > { %784 = vmatprep.mubr.f32.mxu0 %v4806_v0  ;;  %951 = vmatprep.mubr.f32.mxu1 %v4806_v0 }
  0x9f   : > { %3646 = vmatmul.mubr.msk.f32.gmra.mrb[66].mxu0 %vm170_vm0, %v5056_v25  ;;  %3663 = vmatmul.mubr.msk.f32.gmra.mrb[66].mxu1 %vm170_vm0, %v5056_v25 }
  0xa0   : > { %3664 = vmatprep.mubr.msk.f32.mxu0 %vm170_vm0, %v5167_v26  ;;  %3667 = vmatprep.mubr.msk.f32.mxu1 %vm170_vm0, %v5167_v26 }
  0xee   : > { %v288_v27 = vpop.f32.mrb[0].mxu0  ;;  %v455_v28 = vpop.f32.mrb[0].mxu1 }
  0xef   : > { %4118 = vtanh.f32 %v288_v27  ;;  %v290_v29 = vpop.f32.mrb[1].mxu0  ;;  %v457_v30 = vpop.f32.mrb[1].mxu1 }
  0xf0   : > { %4120 = vtanh.f32 %v455_v28 }
  0xf1   : > { %4122 = vtanh.f32 %v290_v29 }
  0xf2   : > { %4124 = vtanh.f32 %v457_v30  ;;  %v294_v31 = vpop.f32.mrb[2].mxu0  ;;  %v461_v32 = vpop.f32.mrb[2].mxu1 }
  0xf3   : > { %4126 = vtanh.f32 %v294_v31  ;;  %v296_v33 = vpop.f32.mrb[3].mxu0  ;;  %v463_v34 = vpop.f32.mrb[3].mxu1 }
  0xf4   : > { %4128 = vtanh.f32 %v461_v32 }
  0xf5   : > { %4130 = vtanh.f32 %v296_v33 }
  0xf6   : > { %4132 = vtanh.f32 %v463_v34  ;;  %v300_v35 = vpop.f32.mrb[4].mxu0  ;;  %v467_v36 = vpop.f32.mrb[4].mxu1 }
  0xf7   : > { %4134 = vtanh.f32 %v300_v35  ;;  %v302_v37 = vpop.f32.mrb[5].mxu0  ;;  %v469_v38 = vpop.f32.mrb[5].mxu1 }
  0xf8   : > { %4136 = vtanh.f32 %v467_v36 }
  0xf9   : > { %v4119_v39 = vpop.eup %4118  ;;  %4138 = vtanh.f32 %v302_v37 }
  0xfa   : > { %v4121_v40 = vpop.eup %4120  ;;  %4140 = vtanh.f32 %v469_v38  ;;  %v306_v41 = vpop.f32.mrb[6].mxu0 }
  0xfb   : > { %v473_v42 = vpop.f32.mrb[6].mxu1  ;;  %v4123_v43 = vpop.eup %4122  ;;  %4142 = vtanh.f32 %v306_v41 }
  0xfc   : > { %v308_v44 = vpop.f32.mrb[7].mxu0  ;;  %v475_v45 = vpop.f32.mrb[7].mxu1  ;;  %4144 = vtanh.f32 %v473_v42 }
  0xfd   : > { %v4125_v46 = vpop.eup %4124  ;;  %4146 = vtanh.f32 %v308_v44 }
  0xfe   : > { %v4127_v47 = vpop.eup %4126  ;;  %4148 = vtanh.f32 %v475_v45  ;;  %v312_v49 = vpop.f32.mrb[8].mxu0 }
  0xff   : > { %v4129_v48 = vpop.eup %4128  ;;  %v479_v50 = vpop.f32.mrb[8].mxu1  ;;  %v3776_v51 = vpack.c.bf16 %v4127_v47, %v4119_v39  ;;  %4150 = vtanh.f32 %v312_v49 }
 0x100   : > { %v4131_v52 = vpop.eup %4130  ;;  %v314_v53 = vpop.f32.mrb[9].mxu0  ;;  %v3808_v55 = vpack.c.bf16 %v4129_v48, %v4121_v40  ;;  %4152 = vtanh.f32 %v479_v50 }
 0x101   : > { %v481_v54 = vpop.f32.mrb[9].mxu1  ;;  %v4133_v56 = vpop.eup %4132  ;;  %v3774_v57 = vpack.c.bf16 %v4131_v52, %v4123_v43  ;;  %4154 = vtanh.f32 %v314_v53 }
 0x102   : > { %v4135_v58 = vpop.eup %4134  ;;  %v3806_v59 = vpack.c.bf16 %v4133_v56, %v4125_v46  ;;  %4156 = vtanh.f32 %v481_v54  ;;  %v318_v61 = vpop.f32.mrb[10].mxu0 }
 0x103   : > { %v4137_v60 = vpop.eup %4136  ;;  %3775 = vmatprep.subr.bf16.mxu0 %v3774_v57  ;;  %v485_v62 = vpop.f32.mrb[10].mxu1  ;;  %4158 = vtanh.f32 %v318_v61 }
 0x104   : > { %v4139_v63 = vpop.eup %4138  ;;  %3807 = vmatprep.subr.bf16.mxu1 %v3806_v59  ;;  %3777 = vmatpush1.bf16.msra.mxu0 %v3776_v51  ;;  %v320_v1 = vpop.f32.mrb[11].mxu0  ;;  %4160 = vtanh.f32 %v485_v62 }
 0x105   : > { %v487_v2 = vpop.f32.mrb[11].mxu1  ;;  %v4141_v3 = vpop.eup %4140  ;;  %3809 = vmatpush1.bf16.msra.mxu1 %v3808_v55  ;;  %4162 = vtanh.f32 %v320_v1 }
 0x106   : > { %v4143_v4 = vpop.eup %4142  ;;  %4164 = vtanh.f32 %v487_v2  ;;  %v324_v6 = vpop.f32.mrb[12].mxu0 }
 0x107   : > { %v4145_v5 = vpop.eup %4144  ;;  %v491_v7 = vpop.f32.mrb[12].mxu1  ;;  %v3780_v8 = vpack.c.bf16 %v4143_v4, %v4135_v58  ;;  %4166 = vtanh.f32 %v324_v6 }
 0x108   : > { %v4147_v9 = vpop.eup %4146  ;;  %v326_v10 = vpop.f32.mrb[13].mxu0  ;;  %v3812_v12 = vpack.c.bf16 %v4145_v5, %v4137_v60  ;;  %4168 = vtanh.f32 %v491_v7 }
 0x109   : > { %v493_v11 = vpop.f32.mrb[13].mxu1  ;;  %v4149_v13 = vpop.eup %4148  ;;  %v3778_v14 = vpack.c.bf16 %v4147_v9, %v4139_v63  ;;  %4170 = vtanh.f32 %v326_v10 }
 0x10a   : > { %v4151_v15 = vpop.eup %4150  ;;  %v3810_v16 = vpack.c.bf16 %v4149_v13, %v4141_v3  ;;  %4172 = vtanh.f32 %v493_v11  ;;  %v330_v18 = vpop.f32.mrb[14].mxu0 }
 0x10b   : > { %v4153_v17 = vpop.eup %4152  ;;  %3779 = vmatprep.subr.bf16.mxu0 %v3778_v14  ;;  %v497_v19 = vpop.f32.mrb[14].mxu1  ;;  %4174 = vtanh.f32 %v330_v18 }
 0x10c   : > { %v4155_v20 = vpop.eup %4154  ;;  %3811 = vmatprep.subr.bf16.mxu1 %v3810_v16  ;;  %3781 = vmatpush1.bf16.msra.mxu0 %v3780_v8  ;;  %v332_v21 = vpop.f32.mrb[15].mxu0  ;;  %4176 = vtanh.f32 %v497_v19 }
 0x10d   : > { %v499_v22 = vpop.f32.mrb[15].mxu1  ;;  %v4157_v23 = vpop.eup %4156  ;;  %3813 = vmatpush1.bf16.msra.mxu1 %v3812_v12  ;;  %4178 = vtanh.f32 %v332_v21 }
 0x10e   : > { %v4159_v24 = vpop.eup %4158  ;;  %4180 = vtanh.f32 %v499_v22  ;;  %v336_v27 = vpop.f32.mrb[16].mxu0 }
 0x10f   : > { %v4161_v25 = vpop.eup %4160  ;;  %v503_v28 = vpop.f32.mrb[16].mxu1  ;;  %v3784_v29 = vpack.c.bf16 %v4159_v24, %v4151_v15  ;;  %4182 = vtanh.f32 %v336_v27 }
 0x110   : > { %v4163_v30 = vpop.eup %4162  ;;  %v338_v31 = vpop.f32.mrb[17].mxu0  ;;  %v3816_v33 = vpack.c.bf16 %v4161_v25, %v4153_v17  ;;  %4184 = vtanh.f32 %v503_v28 }
 0x111   : > { %v505_v32 = vpop.f32.mrb[17].mxu1  ;;  %v4165_v34 = vpop.eup %4164  ;;  %v3782_v35 = vpack.c.bf16 %v4163_v30, %v4155_v20  ;;  %4186 = vtanh.f32 %v338_v31 }
 0x112   : > { %v4167_v36 = vpop.eup %4166  ;;  %v3814_v37 = vpack.c.bf16 %v4165_v34, %v4157_v23  ;;  %4188 = vtanh.f32 %v505_v32  ;;  %v342_v39 = vpop.f32.mrb[18].mxu0 }
 0x113   : > { %v4169_v38 = vpop.eup %4168  ;;  %3783 = vmatprep.subr.bf16.mxu0 %v3782_v35  ;;  %v509_v40 = vpop.f32.mrb[18].mxu1  ;;  %4190 = vtanh.f32 %v342_v39 }
 0x114   : > { %v4171_v41 = vpop.eup %4170  ;;  %3815 = vmatprep.subr.bf16.mxu1 %v3814_v37  ;;  %3785 = vmatpush1.bf16.msra.mxu0 %v3784_v29  ;;  %v344_v42 = vpop.f32.mrb[19].mxu0  ;;  %4192 = vtanh.f32 %v509_v40 }
 0x115   : > { %v511_v43 = vpop.f32.mrb[19].mxu1  ;;  %v4173_v44 = vpop.eup %4172  ;;  %3817 = vmatpush1.bf16.msra.mxu1 %v3816_v33  ;;  %4194 = vtanh.f32 %v344_v42 }
 0x116   : > { %v4175_v45 = vpop.eup %4174  ;;  %4196 = vtanh.f32 %v511_v43  ;;  %v348_v47 = vpop.f32.mrb[20].mxu0 }
 0x117   : > { %v4177_v46 = vpop.eup %4176  ;;  %v515_v48 = vpop.f32.mrb[20].mxu1  ;;  %v3788_v49 = vpack.c.bf16 %v4175_v45, %v4167_v36  ;;  %4198 = vtanh.f32 %v348_v47 }
 0x118   : > { %v4179_v50 = vpop.eup %4178  ;;  %v350_v51 = vpop.f32.mrb[21].mxu0  ;;  %v3820_v53 = vpack.c.bf16 %v4177_v46, %v4169_v38  ;;  %4200 = vtanh.f32 %v515_v48 }
 0x119   : > { %v517_v52 = vpop.f32.mrb[21].mxu1  ;;  %v4181_v54 = vpop.eup %4180  ;;  %v3786_v55 = vpack.c.bf16 %v4179_v50, %v4171_v41  ;;  %4202 = vtanh.f32 %v350_v51 }
 0x11a   : > { %v4183_v56 = vpop.eup %4182  ;;  %v3818_v57 = vpack.c.bf16 %v4181_v54, %v4173_v44  ;;  %4204 = vtanh.f32 %v517_v52  ;;  %v354_v59 = vpop.f32.mrb[22].mxu0 }
 0x11b   : > { %v4185_v58 = vpop.eup %4184  ;;  %3787 = vmatprep.subr.bf16.mxu0 %v3786_v55  ;;  %v521_v60 = vpop.f32.mrb[22].mxu1  ;;  %4206 = vtanh.f32 %v354_v59 }
 0x11c   : > { %v4187_v61 = vpop.eup %4186  ;;  %3819 = vmatprep.subr.bf16.mxu1 %v3818_v57  ;;  %3789 = vmatpush1.bf16.msra.mxu0 %v3788_v49  ;;  %v356_v62 = vpop.f32.mrb[23].mxu0  ;;  %4208 = vtanh.f32 %v521_v60 }
 0x11d   : > { %v523_v63 = vpop.f32.mrb[23].mxu1  ;;  %v4189_v1 = vpop.eup %4188  ;;  %3821 = vmatpush1.bf16.msra.mxu1 %v3820_v53  ;;  %4210 = vtanh.f32 %v356_v62 }
 0x11e   : > { %v4191_v2 = vpop.eup %4190  ;;  %4212 = vtanh.f32 %v523_v63  ;;  %v360_v4 = vpop.f32.mrb[24].mxu0 }
 0x11f   : > { %v4193_v3 = vpop.eup %4192  ;;  %v527_v5 = vpop.f32.mrb[24].mxu1  ;;  %v3792_v6 = vpack.c.bf16 %v4191_v2, %v4183_v56  ;;  %4214 = vtanh.f32 %v360_v4 }
 0x120   : > { %v4195_v7 = vpop.eup %4194  ;;  %v362_v8 = vpop.f32.mrb[25].mxu0  ;;  %v3824_v10 = vpack.c.bf16 %v4193_v3, %v4185_v58  ;;  %4216 = vtanh.f32 %v527_v5 }
 0x121   : > { %v529_v9 = vpop.f32.mrb[25].mxu1  ;;  %v4197_v11 = vpop.eup %4196  ;;  %v3790_v12 = vpack.c.bf16 %v4195_v7, %v4187_v61  ;;  %4218 = vtanh.f32 %v362_v8 }
 0x122   : > { %v4199_v13 = vpop.eup %4198  ;;  %v3822_v14 = vpack.c.bf16 %v4197_v11, %v4189_v1  ;;  %4220 = vtanh.f32 %v529_v9  ;;  %v366_v16 = vpop.f32.mrb[26].mxu0 }
 0x123   : > { %v4201_v15 = vpop.eup %4200  ;;  %3791 = vmatprep.subr.bf16.mxu0 %v3790_v12  ;;  %v533_v17 = vpop.f32.mrb[26].mxu1  ;;  %4222 = vtanh.f32 %v366_v16 }
 0x124   : > { %v4203_v18 = vpop.eup %4202  ;;  %3823 = vmatprep.subr.bf16.mxu1 %v3822_v14  ;;  %3793 = vmatpush1.bf16.msra.mxu0 %v3792_v6  ;;  %v368_v19 = vpop.f32.mrb[27].mxu0  ;;  %4224 = vtanh.f32 %v533_v17 }
 0x125   : > { %v535_v20 = vpop.f32.mrb[27].mxu1  ;;  %v4205_v21 = vpop.eup %4204  ;;  %3825 = vmatpush1.bf16.msra.mxu1 %v3824_v10  ;;  %4226 = vtanh.f32 %v368_v19 }
 0x126   : > { %v4207_v22 = vpop.eup %4206  ;;  %4228 = vtanh.f32 %v535_v20  ;;  %v372_v24 = vpop.f32.mrb[28].mxu0 }
 0x127   : > { %v4209_v23 = vpop.eup %4208  ;;  %v539_v25 = vpop.f32.mrb[28].mxu1  ;;  %v3796_v27 = vpack.c.bf16 %v4207_v22, %v4199_v13  ;;  %4230 = vtanh.f32 %v372_v24 }
 0x128   : > { %v4211_v28 = vpop.eup %4210  ;;  %v374_v29 = vpop.f32.mrb[29].mxu0  ;;  %v3828_v31 = vpack.c.bf16 %v4209_v23, %v4201_v15  ;;  %4232 = vtanh.f32 %v539_v25  ;;  %v5181_v25 = vld [vmem:[%s5645_s1 + $0x128] sm:$0xff] }
 0x129   : > { %v541_v30 = vpop.f32.mrb[29].mxu1  ;;  %v4213_v32 = vpop.eup %4212  ;;  %v3794_v33 = vpack.c.bf16 %v4211_v28, %v4203_v18  ;;  %4234 = vtanh.f32 %v374_v29 }
 0x12a   : > { %v4215_v34 = vpop.eup %4214  ;;  %v3826_v35 = vpack.c.bf16 %v4213_v32, %v4205_v21  ;;  %4236 = vtanh.f32 %v541_v30  ;;  %v378_v37 = vpop.f32.mrb[30].mxu0  ;;  %v5176_v21 = vld [vmem:[%s5645_s1 + $0x110] sm:$0xff]  ;;  %v5190_v32 = vld [vmem:[%s5645_s1 + $0x120] sm:$0xff] }
 0x12b   : > { %v4217_v36 = vpop.eup %4216  ;;  %3795 = vmatprep.subr.bf16.mxu0 %v3794_v33  ;;  %v545_v38 = vpop.f32.mrb[30].mxu1  ;;  %4238 = vtanh.f32 %v378_v37  ;;  %v5197_v37 = vld [vmem:[%s5645_s1 + $0x138] sm:$0xff] }
 0x12c   : > { %v4219_v39 = vpop.eup %4218  ;;  %3827 = vmatprep.subr.bf16.mxu1 %v3826_v35  ;;  %3797 = vmatpush1.bf16.msra.mxu0 %v3796_v27  ;;  %v380_v40 = vpop.f32.mrb[31].mxu0  ;;  %4240 = vtanh.f32 %v545_v38 }
 0x12d   : > { %v547_v41 = vpop.f32.mrb[31].mxu1  ;;  %v4221_v42 = vpop.eup %4220  ;;  %3829 = vmatpush1.bf16.msra.mxu1 %v3828_v31  ;;  %4242 = vtanh.f32 %v380_v40 }
 0x12e   : > { %v4223_v43 = vpop.eup %4222  ;;  %4244 = vtanh.f32 %v547_v41  ;;  %v384_v45 = vpop.f32.mrb[32].mxu0 }
 0x12f   : > { %v4225_v44 = vpop.eup %4224  ;;  %v551_v46 = vpop.f32.mrb[32].mxu1  ;;  %v3800_v47 = vpack.c.bf16 %v4223_v43, %v4215_v34  ;;  %4246 = vtanh.f32 %v384_v45 }
 0x130   : > { %v4227_v48 = vpop.eup %4226  ;;  %v386_v49 = vpop.f32.mrb[33].mxu0  ;;  %v3832_v51 = vpack.c.bf16 %v4225_v44, %v4217_v36  ;;  %4248 = vtanh.f32 %v551_v46  ;;  %v5206_v46 = vld [vmem:[%s5645_s1 + $0x130] sm:$0xff] }
 0x131   : > { %v553_v50 = vpop.f32.mrb[33].mxu1  ;;  %v4229_v52 = vpop.eup %4228  ;;  %v3798_v53 = vpack.c.bf16 %v4227_v48, %v4219_v39  ;;  %4250 = vtanh.f32 %v386_v49 }
 0x132   : > { %v4231_v54 = vpop.eup %4230  ;;  %v3830_v55 = vpack.c.bf16 %v4229_v52, %v4221_v42  ;;  %4252 = vtanh.f32 %v553_v50  ;;  %v690_v57 = vpop.f32.mrb[34].mxu0 }
 0x133   : > { %v4233_v56 = vpop.eup %4232  ;;  %3799 = vmatprep.subr.bf16.mxu0 %v3798_v53  ;;  %v857_v58 = vpop.f32.mrb[34].mxu1  ;;  %4254 = vtanh.f32 %v690_v57 }
 0x134   : > { %v4235_v59 = vpop.eup %4234  ;;  %3831 = vmatprep.subr.bf16.mxu1 %v3830_v55  ;;  %3801 = vmatpush1.bf16.msra.mxu0 %v3800_v47  ;;  %v692_v60 = vpop.f32.mrb[35].mxu0  ;;  %4256 = vtanh.f32 %v857_v58 }
 0x135   : > { %v859_v61 = vpop.f32.mrb[35].mxu1  ;;  %v4237_v62 = vpop.eup %4236  ;;  %3833 = vmatpush1.bf16.msra.mxu1 %v3832_v51  ;;  %4258 = vtanh.f32 %v692_v60 }
 0x136   : > { %v4239_v63 = vpop.eup %4238  ;;  %4260 = vtanh.f32 %v859_v61  ;;  %v696_v2 = vpop.f32.mrb[36].mxu0 }
 0x137   : > { %v4241_v1 = vpop.eup %4240  ;;  %v863_v3 = vpop.f32.mrb[36].mxu1  ;;  %v3804_v4 = vpack.c.bf16 %v4239_v63, %v4231_v54  ;;  %4262 = vtanh.f32 %v696_v2 }
 0x138   : > { %v4243_v5 = vpop.eup %4242  ;;  %v698_v6 = vpop.f32.mrb[37].mxu0  ;;  %v3836_v8 = vpack.c.bf16 %v4241_v1, %v4233_v56  ;;  %4264 = vtanh.f32 %v863_v3 }
 0x139   : > { %v865_v7 = vpop.f32.mrb[37].mxu1  ;;  %v4245_v9 = vpop.eup %4244  ;;  %v3802_v10 = vpack.c.bf16 %v4243_v5, %v4235_v59  ;;  %4266 = vtanh.f32 %v698_v6 }
 0x13a   : > { %v4247_v11 = vpop.eup %4246  ;;  %v3834_v12 = vpack.c.bf16 %v4245_v9, %v4237_v62  ;;  %4268 = vtanh.f32 %v865_v7  ;;  %v702_v14 = vpop.f32.mrb[38].mxu0 }
 0x13b   : > { %v4249_v13 = vpop.eup %4248  ;;  %3803 = vmatprep.subr.bf16.mxu0 %v3802_v10  ;;  %v869_v15 = vpop.f32.mrb[38].mxu1  ;;  %4270 = vtanh.f32 %v702_v14 }
 0x13c   : > { %v4251_v16 = vpop.eup %4250  ;;  %3835 = vmatprep.subr.bf16.mxu1 %v3834_v12  ;;  %3805 = vmatpush1.bf16.msra.mxu0 %v3804_v4  ;;  %v704_v17 = vpop.f32.mrb[39].mxu0  ;;  %4272 = vtanh.f32 %v869_v15 }
 0x13d   : > { %v871_v18 = vpop.f32.mrb[39].mxu1  ;;  %v4253_v19 = vpop.eup %4252  ;;  %3837 = vmatpush1.bf16.msra.mxu1 %v3836_v8  ;;  %1073 = vmatprep.subr.mxu0 %v4251_v16  ;;  %4274 = vtanh.f32 %v704_v17 }
 0x13e   : > { %v4255_v20 = vpop.eup %4254  ;;  %1156 = vmatprep.subr.mxu1 %v4253_v19  ;;  %4276 = vtanh.f32 %v871_v18  ;;  %v708_v23 = vpop.f32.mrb[40].mxu0 }
 0x13f   : > { %v4257_v22 = vpop.eup %4256  ;;  %v875_v24 = vpop.f32.mrb[40].mxu1  ;;  %4278 = vtanh.f32 %v708_v23 }
 0x140   : > { %v4259_v27 = vpop.eup %4258  ;;  %1074 = vmatpush1.msra.mxu0 %v4247_v11  ;;  %v710_v28 = vpop.f32.mrb[41].mxu0  ;;  %4280 = vtanh.f32 %v875_v24 }
 0x141   : > { %v877_v29 = vpop.f32.mrb[41].mxu1  ;;  %v4261_v30 = vpop.eup %4260  ;;  %1157 = vmatpush1.msra.mxu1 %v4249_v13  ;;  %1106 = vmatmul.mubr.f32.vlgmr.msra.gmra.mrb[68].mxu0 %v5176_v21  ;;  %4282 = vtanh.f32 %v710_v28 }
 0x142   : > { %v4263_v31 = vpop.eup %4262  ;;  %1189 = vmatmul.mubr.f32.vlgmr.msra.gmra.mrb[68].mxu1 %v5176_v21  ;;  %3665 = vmatprep.mubr.msk.f32.mxu0 %vm170_vm0, %v5181_v25  ;;  %4284 = vtanh.f32 %v877_v29  ;;  %v714_v34 = vpop.f32.mrb[42].mxu0 }
 0x143   : > { %v4265_v33 = vpop.eup %4264  ;;  %v881_v35 = vpop.f32.mrb[42].mxu1  ;;  %v3840_v36 = vpack.c.bf16 %v4263_v31, %v4255_v20  ;;  %3668 = vmatprep.mubr.msk.f32.mxu1 %vm170_vm0, %v5181_v25  ;;  %4286 = vtanh.f32 %v714_v34 }
 0x144   : > { %v4267_v38 = vpop.eup %4266  ;;  %v716_v39 = vpop.f32.mrb[43].mxu0  ;;  %v3872_v41 = vpack.c.bf16 %v4265_v33, %v4257_v22  ;;  %4288 = vtanh.f32 %v881_v35 }
 0x145   : > { %v883_v40 = vpop.f32.mrb[43].mxu1  ;;  %v4269_v42 = vpop.eup %4268  ;;  %v3838_v43 = vpack.c.bf16 %v4267_v38, %v4259_v27  ;;  %1112 = vmatmul.mubr.f32.gmra.mrb[70].mxu0 %v5190_v32  ;;  %4290 = vtanh.f32 %v716_v39 }
 0x146   : > { %v4271_v44 = vpop.eup %4270  ;;  %v3870_v45 = vpack.c.bf16 %v4269_v42, %v4261_v30  ;;  %1195 = vmatmul.mubr.f32.gmra.mrb[70].mxu1 %v5190_v32  ;;  %3666 = vmatprep.mubr.msk.f32.mxu0 %vm170_vm0, %v5197_v37  ;;  %4292 = vtanh.f32 %v883_v40  ;;  %v720_v48 = vpop.f32.mrb[44].mxu0 }
 0x147   : > { %v4273_v47 = vpop.eup %4272  ;;  %3839 = vmatprep.subr.bf16.mxu0 %v3838_v43  ;;  %v887_v49 = vpop.f32.mrb[44].mxu1  ;;  %3669 = vmatprep.mubr.msk.f32.mxu1 %vm170_vm0, %v5197_v37  ;;  %4294 = vtanh.f32 %v720_v48 }
 0x148   : > { %v4275_v50 = vpop.eup %4274  ;;  %3871 = vmatprep.subr.bf16.mxu1 %v3870_v45  ;;  %3841 = vmatpush1.bf16.msra.mxu0 %v3840_v36  ;;  %v722_v51 = vpop.f32.mrb[45].mxu0  ;;  %4296 = vtanh.f32 %v887_v49 }
 0x149   : > { %v889_v52 = vpop.f32.mrb[45].mxu1  ;;  %v4277_v53 = vpop.eup %4276  ;;  %3873 = vmatpush1.bf16.msra.mxu1 %v3872_v41  ;;  %1118 = vmatmul.mubr.f32.gmra.mrb[72].mxu0 %v5206_v46  ;;  %4298 = vtanh.f32 %v722_v51 }
 0x14a   : > { %v4279_v54 = vpop.eup %4278  ;;  %1201 = vmatmul.mubr.f32.gmra.mrb[72].mxu1 %v5206_v46  ;;  %3670 = vmatprep.mubr.msk.f32.mxu0 %vm170_vm0, %v5167_v26  ;;  %4300 = vtanh.f32 %v889_v52  ;;  %v726_v56 = vpop.f32.mrb[46].mxu0 }
 0x14b   : > { %v4281_v55 = vpop.eup %4280  ;;  %v893_v57 = vpop.f32.mrb[46].mxu1  ;;  %v3844_v58 = vpack.c.bf16 %v4279_v54, %v4271_v44  ;;  %3673 = vmatprep.mubr.msk.f32.mxu1 %vm170_vm0, %v5167_v26  ;;  %4302 = vtanh.f32 %v726_v56 }
 0x14c   : > { %v4283_v59 = vpop.eup %4282  ;;  %v728_v60 = vpop.f32.mrb[47].mxu0  ;;  %v3876_v62 = vpack.c.bf16 %v4281_v55, %v4273_v47  ;;  %4304 = vtanh.f32 %v893_v57 }
 0x14d   : > { %v895_v61 = vpop.f32.mrb[47].mxu1  ;;  %v4285_v63 = vpop.eup %4284  ;;  %v3842_v1 = vpack.c.bf16 %v4283_v59, %v4275_v50  ;;  %4306 = vtanh.f32 %v728_v60 }
 0x14e   : > { %v4287_v2 = vpop.eup %4286  ;;  %v3874_v3 = vpack.c.bf16 %v4285_v63, %v4277_v53  ;;  %4308 = vtanh.f32 %v895_v61  ;;  %v732_v5 = vpop.f32.mrb[48].mxu0 }
 0x14f   : > { %v4289_v4 = vpop.eup %4288  ;;  %3843 = vmatprep.subr.bf16.mxu0 %v3842_v1  ;;  %v899_v6 = vpop.f32.mrb[48].mxu1  ;;  %4310 = vtanh.f32 %v732_v5 }
 0x150   : > { %v4291_v7 = vpop.eup %4290  ;;  %3875 = vmatprep.subr.bf16.mxu1 %v3874_v3  ;;  %3845 = vmatpush1.bf16.msra.mxu0 %v3844_v58  ;;  %v734_v26 = vpop.f32.mrb[49].mxu0  ;;  %4312 = vtanh.f32 %v899_v6 }
 0x151   : > { %v901_v8 = vpop.f32.mrb[49].mxu1  ;;  %v4293_v9 = vpop.eup %4292  ;;  %3877 = vmatpush1.bf16.msra.mxu1 %v3876_v62  ;;  %4314 = vtanh.f32 %v734_v26 }
 0x152   : > { %v4295_v10 = vpop.eup %4294  ;;  %4316 = vtanh.f32 %v901_v8  ;;  %v738_v12 = vpop.f32.mrb[50].mxu0 }
 0x153   : > { %v4297_v11 = vpop.eup %4296  ;;  %v905_v13 = vpop.f32.mrb[50].mxu1  ;;  %v3848_v14 = vpack.c.bf16 %v4295_v10, %v4287_v2  ;;  %4318 = vtanh.f32 %v738_v12 }
 0x154   : > { %v4299_v15 = vpop.eup %4298  ;;  %v740_v16 = vpop.f32.mrb[51].mxu0  ;;  %v3880_v18 = vpack.c.bf16 %v4297_v11, %v4289_v4  ;;  %4320 = vtanh.f32 %v905_v13 }
 0x155   : > { %v907_v17 = vpop.f32.mrb[51].mxu1  ;;  %v4301_v19 = vpop.eup %4300  ;;  %v3846_v20 = vpack.c.bf16 %v4299_v15, %v4291_v7  ;;  %4322 = vtanh.f32 %v740_v16 }
 0x156   : > { %v4303_v22 = vpop.eup %4302  ;;  %v3878_v23 = vpack.c.bf16 %v4301_v19, %v4293_v9  ;;  %4324 = vtanh.f32 %v907_v17  ;;  %v744_v27 = vpop.f32.mrb[52].mxu0 }
 0x157   : > { %v4305_v24 = vpop.eup %4304  ;;  %3847 = vmatprep.subr.bf16.mxu0 %v3846_v20  ;;  %v911_v28 = vpop.f32.mrb[52].mxu1  ;;  %4326 = vtanh.f32 %v744_v27 }
 0x158   : > { %v4307_v29 = vpop.eup %4306  ;;  %3879 = vmatprep.subr.bf16.mxu1 %v3878_v23  ;;  %3849 = vmatpush1.bf16.msra.mxu0 %v3848_v14  ;;  %v746_v30 = vpop.f32.mrb[53].mxu0  ;;  %4328 = vtanh.f32 %v911_v28 }
 0x159   : > { %v913_v31 = vpop.f32.mrb[53].mxu1  ;;  %v4309_v33 = vpop.eup %4308  ;;  %3881 = vmatpush1.bf16.msra.mxu1 %v3880_v18  ;;  %4330 = vtanh.f32 %v746_v30 }
 0x15a   : > { %v4311_v34 = vpop.eup %4310  ;;  %4332 = vtanh.f32 %v913_v31  ;;  %v750_v36 = vpop.f32.mrb[54].mxu0 }
 0x15b   : > { %v4313_v35 = vpop.eup %4312  ;;  %v917_v38 = vpop.f32.mrb[54].mxu1  ;;  %v3852_v39 = vpack.c.bf16 %v4311_v34, %v4303_v22  ;;  %4334 = vtanh.f32 %v750_v36 }
 0x15c   : > { %v4315_v40 = vpop.eup %4314  ;;  %v752_v41 = vpop.f32.mrb[55].mxu0  ;;  %v3884_v43 = vpack.c.bf16 %v4313_v35, %v4305_v24  ;;  %4336 = vtanh.f32 %v917_v38 }
 0x15d   : > { %v919_v42 = vpop.f32.mrb[55].mxu1  ;;  %v4317_v44 = vpop.eup %4316  ;;  %v3850_v45 = vpack.c.bf16 %v4315_v40, %v4307_v29  ;;  %4338 = vtanh.f32 %v752_v41 }
 0x15e   : > { %v4319_v47 = vpop.eup %4318  ;;  %v3882_v48 = vpack.c.bf16 %v4317_v44, %v4309_v33  ;;  %4340 = vtanh.f32 %v919_v42  ;;  %v756_v50 = vpop.f32.mrb[56].mxu0 }
 0x15f   : > { %v4321_v49 = vpop.eup %4320  ;;  %3851 = vmatprep.subr.bf16.mxu0 %v3850_v45  ;;  %v923_v51 = vpop.f32.mrb[56].mxu1  ;;  %4342 = vtanh.f32 %v756_v50 }
 0x160   : > { %v4323_v52 = vpop.eup %4322  ;;  %3883 = vmatprep.subr.bf16.mxu1 %v3882_v48  ;;  %3853 = vmatpush1.bf16.msra.mxu0 %v3852_v39  ;;  %v758_v53 = vpop.f32.mrb[57].mxu0  ;;  %4344 = vtanh.f32 %v923_v51 }
 0x161   : > { %v925_v54 = vpop.f32.mrb[57].mxu1  ;;  %v4325_v55 = vpop.eup %4324  ;;  %3885 = vmatpush1.bf16.msra.mxu1 %v3884_v43  ;;  %4346 = vtanh.f32 %v758_v53 }
 0x162   : > { %v4327_v56 = vpop.eup %4326  ;;  %4348 = vtanh.f32 %v925_v54  ;;  %v762_v58 = vpop.f32.mrb[58].mxu0 }
 0x163   : > { %v4329_v57 = vpop.eup %4328  ;;  %v929_v59 = vpop.f32.mrb[58].mxu1  ;;  %v3856_v60 = vpack.c.bf16 %v4327_v56, %v4319_v47  ;;  %4350 = vtanh.f32 %v762_v58 }
 0x164   : > { %v4331_v61 = vpop.eup %4330  ;;  %v764_v62 = vpop.f32.mrb[59].mxu0  ;;  %v3888_v1 = vpack.c.bf16 %v4329_v57, %v4321_v49  ;;  %4352 = vtanh.f32 %v929_v59 }
 0x165   : > { %v931_v63 = vpop.f32.mrb[59].mxu1  ;;  %v4333_v2 = vpop.eup %4332  ;;  %v3854_v3 = vpack.c.bf16 %v4331_v61, %v4323_v52  ;;  %4354 = vtanh.f32 %v764_v62 }
 0x166   : > { %v4335_v4 = vpop.eup %4334  ;;  %v3886_v5 = vpack.c.bf16 %v4333_v2, %v4325_v55  ;;  %4356 = vtanh.f32 %v931_v63  ;;  %v768_v7 = vpop.f32.mrb[60].mxu0 }
 0x167   : > { %v4337_v6 = vpop.eup %4336  ;;  %3855 = vmatprep.subr.bf16.mxu0 %v3854_v3  ;;  %v935_v26 = vpop.f32.mrb[60].mxu1  ;;  %4358 = vtanh.f32 %v768_v7 }
 0x168   : > { %v4339_v8 = vpop.eup %4338  ;;  %3887 = vmatprep.subr.bf16.mxu1 %v3886_v5  ;;  %3857 = vmatpush1.bf16.msra.mxu0 %v3856_v60  ;;  %v770_v9 = vpop.f32.mrb[61].mxu0  ;;  %4360 = vtanh.f32 %v935_v26 }
 0x169   : > { %v937_v10 = vpop.f32.mrb[61].mxu1  ;;  %v4341_v11 = vpop.eup %4340  ;;  %3889 = vmatpush1.bf16.msra.mxu1 %v3888_v1  ;;  %4362 = vtanh.f32 %v770_v9 }
 0x16a   : > { %v4343_v12 = vpop.eup %4342  ;;  %4364 = vtanh.f32 %v937_v10  ;;  %v774_v14 = vpop.f32.mrb[62].mxu0 }
 0x16b   : > { %v4345_v13 = vpop.eup %4344  ;;  %v941_v15 = vpop.f32.mrb[62].mxu1  ;;  %v3860_v16 = vpack.c.bf16 %v4343_v12, %v4335_v4  ;;  %4366 = vtanh.f32 %v774_v14 }
 0x16c   : > { %v4347_v17 = vpop.eup %4346  ;;  %v776_v18 = vpop.f32.mrb[63].mxu0  ;;  %v3892_v20 = vpack.c.bf16 %v4345_v13, %v4337_v6  ;;  %4368 = vtanh.f32 %v941_v15 }
 0x16d   : > { %v943_v19 = vpop.f32.mrb[63].mxu1  ;;  %v4349_v22 = vpop.eup %4348  ;;  %v3858_v23 = vpack.c.bf16 %v4347_v17, %v4339_v8  ;;  %4370 = vtanh.f32 %v776_v18 }
 0x16e   : > { %v4351_v24 = vpop.eup %4350  ;;  %v3890_v27 = vpack.c.bf16 %v4349_v22, %v4341_v11  ;;  %4372 = vtanh.f32 %v943_v19  ;;  %v780_v29 = vpop.f32.mrb[64].mxu0 }
 0x16f   : > { %v4353_v28 = vpop.eup %4352  ;;  %3859 = vmatprep.subr.bf16.mxu0 %v3858_v23  ;;  %v947_v30 = vpop.f32.mrb[64].mxu1  ;;  %4374 = vtanh.f32 %v780_v29  ;;  %v5245_v29 = vld [vmem:[%s5645_s1 + $0x150] sm:$0xff] }
 0x170   : > { %v4355_v31 = vpop.eup %4354  ;;  %3891 = vmatprep.subr.bf16.mxu1 %v3890_v27  ;;  %3861 = vmatpush1.bf16.msra.mxu0 %v3860_v16  ;;  %v782_v33 = vpop.f32.mrb[65].mxu0  ;;  %4376 = vtanh.f32 %v947_v30  ;;  %v5256_v30 = vld [vmem:[%s5645_s1 + $0x160] sm:$0xff] }
 0x171   : > { %v949_v34 = vpop.f32.mrb[65].mxu1  ;;  %v4357_v35 = vpop.eup %4356  ;;  %3893 = vmatpush1.bf16.msra.mxu1 %v3892_v20  ;;  %4378 = vtanh.f32 %v782_v33 }
 0x172   : > { %v4359_v36 = vpop.eup %4358  ;;  %4380 = vtanh.f32 %v949_v34  ;;  %v786_v39 = vpop.f32.mrb[66].mxu0 }
 0x173   : > { %v4361_v38 = vpop.eup %4360  ;;  %v953_v40 = vpop.f32.mrb[66].mxu1  ;;  %v3864_v41 = vpack.c.bf16 %v4359_v36, %v4351_v24 }
 0x174   : > { %v4363_v42 = vpop.eup %4362  ;;  %v788_v43 = vpop.f32.mrb[67].mxu0  ;;  %v3896_v45 = vpack.c.bf16 %v4361_v38, %v4353_v28  ;;  %v5235_v28 = vld [vmem:[%s5645_s1 + $0x140] sm:$0xff] }
 0x175   : > { %v955_v44 = vpop.f32.mrb[67].mxu1  ;;  %v4365_v47 = vpop.eup %4364  ;;  %v3862_v48 = vpack.c.bf16 %v4363_v42, %v4355_v31  ;;  %4382 = vtanh.f32 %v788_v43 }
 0x176   : > { %v4367_v49 = vpop.eup %4366  ;;  %v3894_v50 = vpack.c.bf16 %v4365_v47, %v4357_v35  ;;  %4384 = vtanh.f32 %v955_v44 }
 0x177   : > { %v4369_v51 = vpop.eup %4368  ;;  %3863 = vmatprep.subr.bf16.mxu0 %v3862_v48  ;;  %4386 = vtanh.f32 %v786_v39 }
 0x178   : > { %v4371_v52 = vpop.eup %4370  ;;  %3895 = vmatprep.subr.bf16.mxu1 %v3894_v50  ;;  %3865 = vmatpush1.bf16.msra.mxu0 %v3864_v41  ;;  %4388 = vtanh.f32 %v953_v40 }
 0x179   : > { %v4373_v53 = vpop.eup %4372  ;;  %3897 = vmatpush1.bf16.msra.mxu1 %v3896_v45 }
 0x17a   : > { %v4375_v54 = vpop.eup %4374 }
 0x17b   : > { %v4377_v55 = vpop.eup %4376  ;;  %v3868_v56 = vpack.c.bf16 %v4375_v54, %v4367_v49 }
 0x17c   : > { %v4379_v57 = vpop.eup %4378  ;;  %v3900_v58 = vpack.c.bf16 %v4377_v55, %v4369_v51 }
 0x17d   : > { %v4381_v59 = vpop.eup %4380  ;;  %v3866_v60 = vpack.c.bf16 %v4379_v57, %v4371_v52 }
 0x17e   : > { %v3898_v61 = vpack.c.bf16 %v4381_v59, %v4373_v53 }
 0x17f   : > { %3867 = vmatprep.subr.bf16.mxu0 %v3866_v60  ;;  %v4383_v62 = vpop.eup %4382 }
 0x180   : > { %3899 = vmatprep.subr.bf16.mxu1 %v3898_v61  ;;  %3869 = vmatpush1.bf16.msra.mxu0 %v3868_v56  ;;  %v4385_v63 = vpop.eup %4384 }
 0x181   : > { %3901 = vmatpush1.bf16.msra.mxu1 %v3900_v58  ;;  %1251 = vmatprep.subr.mxu0 %v4383_v62  ;;  %v4387_v1 = vpop.eup %4386 }
 0x182   : > { %1334 = vmatprep.subr.mxu1 %v4385_v63  ;;  %v4389_v2 = vpop.eup %4388 }
 0x184   : > { %1252 = vmatpush1.msra.mxu0 %v4387_v1 }
 0x185   : > { %1335 = vmatpush1.msra.mxu1 %v4389_v2  ;;  %1284 = vmatmul.mubr.f32.vlgmr.msra.gmra.mrb[74].mxu0 %v5176_v21 }
 0x186   : > { %1367 = vmatmul.mubr.f32.vlgmr.msra.gmra.mrb[74].mxu1 %v5176_v21  ;;  %3671 = vmatprep.mubr.msk.f32.mxu0 %vm170_vm0, %v5181_v25 }
 0x187   : > { %3674 = vmatprep.mubr.msk.f32.mxu1 %vm170_vm0, %v5181_v25 }
 0x189   : > { %1290 = vmatmul.mubr.f32.gmra.mrb[76].mxu0 %v5190_v32 }
 0x18a   : > { %1373 = vmatmul.mubr.f32.gmra.mrb[76].mxu1 %v5190_v32  ;;  %3672 = vmatprep.mubr.msk.f32.mxu0 %vm170_vm0, %v5197_v37 }
 0x18b   : > { %3675 = vmatprep.mubr.msk.f32.mxu1 %vm170_vm0, %v5197_v37 }
 0x18d   : > { %1296 = vmatmul.mubr.f32.gmra.mrb[78].mxu0 %v5206_v46 }
 0x18e   : > { %1379 = vmatmul.mubr.f32.gmra.mrb[78].mxu1 %v5206_v46  ;;  %1474 = vmatprep.mubr.f32.mxu0 %v4806_v0 }
 0x18f   : > { %1557 = vmatprep.mubr.f32.mxu1 %v4806_v0 }
 0x214   : > { %v1107_v21 = vpop.f32.mrb[68].mxu0 }
 0x215   : > { %4390 = vtanh.f32 %v1107_v21  ;;  %v1190_v25 = vpop.f32.mrb[68].mxu1  ;;  %v1109_v3 = vpop.f32.mrb[69].mxu0 }
 0x216   : > { %4392 = vtanh.f32 %v1190_v25  ;;  %v1192_v32 = vpop.f32.mrb[69].mxu1 }
 0x217   : > { %4394 = vtanh.f32 %v1109_v3 }
 0x218   : > { %4396 = vtanh.f32 %v1192_v32  ;;  %v1113_v4 = vpop.f32.mrb[70].mxu0 }
 0x219   : > { %4398 = vtanh.f32 %v1113_v4  ;;  %v1196_v5 = vpop.f32.mrb[70].mxu1  ;;  %v1115_v37 = vpop.f32.mrb[71].mxu0 }
 0x21a   : > { %4400 = vtanh.f32 %v1196_v5  ;;  %v1198_v6 = vpop.f32.mrb[71].mxu1 }
 0x21b   : > { %4402 = vtanh.f32 %v1115_v37 }
 0x21c   : > { %4404 = vtanh.f32 %v1198_v6  ;;  %v1119_v46 = vpop.f32.mrb[72].mxu0 }
 0x21d   : > { %v1202_v7 = vpop.f32.mrb[72].mxu1  ;;  %v1121_v26 = vpop.f32.mrb[73].mxu0  ;;  %4406 = vtanh.f32 %v1119_v46 }
 0x21e   : > { %v1204_v8 = vpop.f32.mrb[73].mxu1  ;;  %4408 = vtanh.f32 %v1121_v26 }
 0x21f   : > { %v4391_v9 = vpop.eup %4390  ;;  %4410 = vtanh.f32 %v1204_v8 }
 0x220   : > { %v4393_v10 = vpop.eup %4392  ;;  %4412 = vtanh.f32 %v1202_v7 }
 0x221   : > { %v4395_v11 = vpop.eup %4394 }
 0x222   : > { %v4397_v12 = vpop.eup %4396 }
 0x223   : > { %v4399_v13 = vpop.eup %4398 }
 0x224   : > { %v4401_v14 = vpop.eup %4400  ;;  %v3904_v15 = vpack.c.bf16 %v4399_v13, %v4391_v9 }
 0x225   : > { %v4403_v16 = vpop.eup %4402  ;;  %v3908_v17 = vpack.c.bf16 %v4401_v14, %v4393_v10 }
 0x226   : > { %v4405_v18 = vpop.eup %4404  ;;  %v3902_v19 = vpack.c.bf16 %v4403_v16, %v4395_v11 }
 0x227   : > { %v3906_v20 = vpack.c.bf16 %v4405_v18, %v4397_v12  ;;  %v4407_v22 = vpop.eup %4406 }
 0x228   : > { %3903 = vmatprep.subr.bf16.mxu0 %v3902_v19  ;;  %v4409_v23 = vpop.eup %4408 }
 0x229   : > { %3907 = vmatprep.subr.bf16.mxu1 %v3906_v20  ;;  %3905 = vmatpush1.bf16.msra.mxu0 %v3904_v15  ;;  %v4411_v24 = vpop.eup %4410 }
 0x22a   : > { %3909 = vmatpush1.bf16.msra.mxu1 %v3908_v17  ;;  %1414 = vmatprep.subr.mxu0 %v4409_v23  ;;  %v4413_v27 = vpop.eup %4412  ;;  %v5296_v23 = vld [vmem:[%s5645_s1 + $0x180] sm:$0xff] }
 0x22b   : > { %1497 = vmatprep.subr.mxu1 %v4411_v24  ;;  %v5307_v24 = vld [vmem:[%s5645_s1 + $0x190] sm:$0xff] }
 0x22d   : > { %1415 = vmatpush1.msra.mxu0 %v4407_v22  ;;  %v5286_v22 = vld [vmem:[%s5645_s1 + $0x170] sm:$0xff] }
 0x22e   : > { %1498 = vmatpush1.msra.mxu1 %v4413_v27  ;;  %3676 = vmatmul.mubr.msk.f32.vlgmr.msra.gmra.mrb[80].mxu0 %vm1400_vm1, %v5235_v28 }
 0x22f   : > { %3679 = vmatmul.mubr.msk.f32.vlgmr.msra.gmra.mrb[80].mxu1 %vm1400_vm1, %v5235_v28  ;;  %1480 = vmatprep.mubr.f32.mxu0 %v4806_v0 }
 0x230   : > { %1563 = vmatprep.mubr.f32.mxu1 %v4806_v0 }
 0x232   : > { %3677 = vmatmul.mubr.msk.f32.gmra.mrb[82].mxu0 %vm1400_vm1, %v5245_v29 }
 0x233   : > { %3680 = vmatmul.mubr.msk.f32.gmra.mrb[82].mxu1 %vm1400_vm1, %v5245_v29  ;;  %1486 = vmatprep.mubr.f32.mxu0 %v4806_v0 }
 0x234   : > { %1569 = vmatprep.mubr.f32.mxu1 %v4806_v0 }
 0x236   : > { %3678 = vmatmul.mubr.msk.f32.gmra.mrb[84].mxu0 %vm1400_vm1, %v5256_v30 }
 0x237   : > { %3681 = vmatmul.mubr.msk.f32.gmra.mrb[84].mxu1 %vm1400_vm1, %v5256_v30  ;;  %1652 = vmatprep.mubr.f32.mxu0 %v4806_v0 }
 0x238   : > { %1735 = vmatprep.mubr.f32.mxu1 %v4806_v0 }
 0x258   : > { %v1285_v31 = vpop.f32.mrb[74].mxu0 }
 0x259   : > { %4414 = vtanh.f32 %v1285_v31  ;;  %v1368_v33 = vpop.f32.mrb[74].mxu1  ;;  %v1287_v34 = vpop.f32.mrb[75].mxu0 }
 0x25a   : > { %4416 = vtanh.f32 %v1368_v33  ;;  %v1370_v35 = vpop.f32.mrb[75].mxu1 }
 0x25b   : > { %4418 = vtanh.f32 %v1287_v34 }
 0x25c   : > { %4420 = vtanh.f32 %v1370_v35  ;;  %v1291_v36 = vpop.f32.mrb[76].mxu0 }
 0x25d   : > { %4422 = vtanh.f32 %v1291_v36  ;;  %v1374_v38 = vpop.f32.mrb[76].mxu1  ;;  %v1293_v39 = vpop.f32.mrb[77].mxu0 }
 0x25e   : > { %4424 = vtanh.f32 %v1374_v38  ;;  %v1376_v40 = vpop.f32.mrb[77].mxu1 }
 0x25f   : > { %4426 = vtanh.f32 %v1293_v39 }
 0x260   : > { %4428 = vtanh.f32 %v1376_v40  ;;  %v1297_v41 = vpop.f32.mrb[78].mxu0 }
 0x261   : > { %v1380_v42 = vpop.f32.mrb[78].mxu1  ;;  %v1299_v43 = vpop.f32.mrb[79].mxu0 }
 0x262   : > { %v1382_v44 = vpop.f32.mrb[79].mxu1  ;;  %4430 = vtanh.f32 %v1299_v43 }
 0x263   : > { %v4415_v45 = vpop.eup %4414  ;;  %4432 = vtanh.f32 %v1382_v44 }
 0x264   : > { %v4417_v47 = vpop.eup %4416  ;;  %4434 = vtanh.f32 %v1297_v41 }
 0x265   : > { %v4419_v48 = vpop.eup %4418  ;;  %4436 = vtanh.f32 %v1380_v42 }
 0x266   : > { %v4421_v49 = vpop.eup %4420 }
 0x267   : > { %v4423_v50 = vpop.eup %4422 }
 0x268   : > { %v4425_v51 = vpop.eup %4424  ;;  %v3912_v52 = vpack.c.bf16 %v4423_v50, %v4415_v45 }
 0x269   : > { %v4427_v53 = vpop.eup %4426  ;;  %v3916_v54 = vpack.c.bf16 %v4425_v51, %v4417_v47 }
 0x26a   : > { %v4429_v55 = vpop.eup %4428  ;;  %v3910_v56 = vpack.c.bf16 %v4427_v53, %v4419_v48 }
 0x26b   : > { %v3914_v57 = vpack.c.bf16 %v4429_v55, %v4421_v49 }
 0x26c   : > { %3911 = vmatprep.subr.bf16.mxu0 %v3910_v56  ;;  %v4431_v58 = vpop.eup %4430 }
 0x26d   : > { %3915 = vmatprep.subr.bf16.mxu1 %v3914_v57  ;;  %3913 = vmatpush1.bf16.msra.mxu0 %v3912_v52  ;;  %v4433_v59 = vpop.eup %4432 }
 0x26e   : > { %3917 = vmatpush1.bf16.msra.mxu1 %v3916_v54  ;;  %1592 = vmatprep.subr.mxu0 %v4431_v58  ;;  %v4435_v60 = vpop.eup %4434 }
 0x26f   : > { %1675 = vmatprep.subr.mxu1 %v4433_v59  ;;  %v4437_v61 = vpop.eup %4436 }
 0x271   : > { %1593 = vmatpush1.msra.mxu0 %v4435_v60 }
 0x272   : > { %1676 = vmatpush1.msra.mxu1 %v4437_v61  ;;  %3682 = vmatmul.mubr.msk.f32.vlgmr.msra.gmra.mrb[86].mxu0 %vm1400_vm1, %v5235_v28 }
 0x273   : > { %3685 = vmatmul.mubr.msk.f32.vlgmr.msra.gmra.mrb[86].mxu1 %vm1400_vm1, %v5235_v28  ;;  %1658 = vmatprep.mubr.f32.mxu0 %v4806_v0 }
 0x274   : > { %1741 = vmatprep.mubr.f32.mxu1 %v4806_v0 }
 0x276   : > { %3683 = vmatmul.mubr.msk.f32.gmra.mrb[88].mxu0 %vm1400_vm1, %v5245_v29 }
 0x277   : > { %3686 = vmatmul.mubr.msk.f32.gmra.mrb[88].mxu1 %vm1400_vm1, %v5245_v29  ;;  %1664 = vmatprep.mubr.f32.mxu0 %v4806_v0 }
 0x278   : > { %1747 = vmatprep.mubr.f32.mxu1 %v4806_v0 }
 0x27a   : > { %3684 = vmatmul.mubr.msk.f32.gmra.mrb[90].mxu0 %vm1400_vm1, %v5256_v30 }
 0x27b   : > { %3687 = vmatmul.mubr.msk.f32.gmra.mrb[90].mxu1 %vm1400_vm1, %v5256_v30  ;;  %1842 = vmatprep.mubr.f32.mxu0 %v4806_v0 }
 0x27c   : > { %1925 = vmatprep.mubr.f32.mxu1 %v4806_v0 }
 0x301   : > { %v1476_v62 = vpop.f32.mrb[80].mxu0 }
 0x302   : > { %4438 = vtanh.f32 %v1476_v62  ;;  %v1559_v63 = vpop.f32.mrb[80].mxu1  ;;  %v1478_v1 = vpop.f32.mrb[81].mxu0 }
 0x303   : > { %4440 = vtanh.f32 %v1559_v63  ;;  %v1561_v2 = vpop.f32.mrb[81].mxu1 }
 0x304   : > { %4442 = vtanh.f32 %v1478_v1 }
 0x305   : > { %4444 = vtanh.f32 %v1561_v2  ;;  %v1482_v21 = vpop.f32.mrb[82].mxu0 }
 0x306   : > { %4446 = vtanh.f32 %v1482_v21  ;;  %v1565_v25 = vpop.f32.mrb[82].mxu1  ;;  %v1484_v3 = vpop.f32.mrb[83].mxu0 }
 0x307   : > { %4448 = vtanh.f32 %v1565_v25  ;;  %v1567_v32 = vpop.f32.mrb[83].mxu1 }
 0x308   : > { %4450 = vtanh.f32 %v1484_v3 }
 0x309   : > { %4452 = vtanh.f32 %v1567_v32  ;;  %v1488_v4 = vpop.f32.mrb[84].mxu0 }
 0x30a   : > { %v1571_v5 = vpop.f32.mrb[84].mxu1  ;;  %v1490_v37 = vpop.f32.mrb[85].mxu0  ;;  %4454 = vtanh.f32 %v1488_v4 }
 0x30b   : > { %v1573_v6 = vpop.f32.mrb[85].mxu1  ;;  %4456 = vtanh.f32 %v1490_v37 }
 0x30c   : > { %v4439_v46 = vpop.eup %4438  ;;  %4458 = vtanh.f32 %v1573_v6 }
 0x30d   : > { %v4441_v7 = vpop.eup %4440  ;;  %4460 = vtanh.f32 %v1571_v5 }
 0x30e   : > { %v4443_v26 = vpop.eup %4442 }
 0x30f   : > { %v4445_v8 = vpop.eup %4444 }
 0x310   : > { %v4447_v9 = vpop.eup %4446 }
 0x311   : > { %v4449_v10 = vpop.eup %4448  ;;  %v3920_v11 = vpack.c.bf16 %v4447_v9, %v4439_v46  ;;  %v5337_v46 = vld [vmem:[%s5645_s1 + $0x1a0] sm:$0xff] }
 0x312   : > { %v4451_v12 = vpop.eup %4450  ;;  %v3924_v13 = vpack.c.bf16 %v4449_v10, %v4441_v7  ;;  %v5347_v7 = vld [vmem:[%s5645_s1 + $0x1b0] sm:$0xff]  ;;  %v2114_v9 = vld [vmem:[%s5645_s1 + $0x1e0] sm:$0xff] }
 0x313   : > { %v4453_v14 = vpop.eup %4452  ;;  %v3918_v15 = vpack.c.bf16 %v4451_v12, %v4443_v26  ;;  %v5358_v26 = vld [vmem:[%s5645_s1 + $0x1c0] sm:$0xff]  ;;  %v2115_v10 = vld [vmem:[%s5645_s1 + $0x1f0] sm:$0xff] }
 0x314   : > { %v3922_v16 = vpack.c.bf16 %v4453_v14, %v4445_v8  ;;  %v4455_v17 = vpop.eup %4454  ;;  %v5369_v8 = vld [vmem:[%s5645_s1 + $0x1d0] sm:$0xff] }
 0x315   : > { %3919 = vmatprep.subr.bf16.mxu0 %v3918_v15  ;;  %v4457_v18 = vpop.eup %4456  ;;  %v2117_v12 = vld [vmem:[%s5645_s1 + $0x210] sm:$0xff] }
 0x316   : > { %3923 = vmatprep.subr.bf16.mxu1 %v3922_v16  ;;  %3921 = vmatpush1.bf16.msra.mxu0 %v3920_v11  ;;  %v4459_v19 = vpop.eup %4458  ;;  %v2116_v11 = vld [vmem:[%s5645_s1 + $0x200] sm:$0xff] }
 0x317   : > { %3925 = vmatpush1.bf16.msra.mxu1 %v3924_v13  ;;  %1782 = vmatprep.subr.mxu0 %v4457_v18  ;;  %v4461_v20 = vpop.eup %4460 }
 0x318   : > { %1865 = vmatprep.subr.mxu1 %v4459_v19 }
 0x31a   : > { %1783 = vmatpush1.msra.mxu0 %v4455_v17 }
 0x31b   : > { %1866 = vmatpush1.msra.mxu1 %v4461_v20  ;;  %3688 = vmatmul.mubr.msk.f32.vlgmr.msra.gmra.mrb[92].mxu0 %vm1400_vm1, %v5286_v22 }
 0x31c   : > { %3691 = vmatmul.mubr.msk.f32.vlgmr.msra.gmra.mrb[92].mxu1 %vm1400_vm1, %v5286_v22  ;;  %1848 = vmatprep.mubr.f32.mxu0 %v4806_v0 }
 0x31d   : > { %1931 = vmatprep.mubr.f32.mxu1 %v4806_v0 }
 0x31f   : > { %3689 = vmatmul.mubr.msk.f32.gmra.mrb[94].mxu0 %vm1400_vm1, %v5296_v23 }
 0x320   : > { %3692 = vmatmul.mubr.msk.f32.gmra.mrb[94].mxu1 %vm1400_vm1, %v5296_v23  ;;  %1854 = vmatprep.mubr.f32.mxu0 %v4806_v0 }
 0x321   : > { %1937 = vmatprep.mubr.f32.mxu1 %v4806_v0 }
 0x323   : > { %3690 = vmatmul.mubr.msk.f32.gmra.mrb[96].mxu0 %vm1400_vm1, %v5307_v24 }
 0x324   : > { %3693 = vmatmul.mubr.msk.f32.gmra.mrb[96].mxu1 %vm1400_vm1, %v5307_v24  ;;  %2008 = vmatprep.mubr.f32.mxu0 %v4806_v0 }
 0x325   : > { %2091 = vmatprep.mubr.f32.mxu1 %v4806_v0 }
 0x345   : > { %v1654_v27 = vpop.f32.mrb[86].mxu0 }
 0x346   : > { %4462 = vtanh.f32 %v1654_v27  ;;  %v1737_v28 = vpop.f32.mrb[86].mxu1  ;;  %v1656_v29 = vpop.f32.mrb[87].mxu0 }
 0x347   : > { %4464 = vtanh.f32 %v1737_v28  ;;  %v1739_v30 = vpop.f32.mrb[87].mxu1 }
 0x348   : > { %4466 = vtanh.f32 %v1656_v29 }
 0x349   : > { %4468 = vtanh.f32 %v1739_v30  ;;  %v1660_v31 = vpop.f32.mrb[88].mxu0 }
 0x34a   : > { %4470 = vtanh.f32 %v1660_v31  ;;  %v1743_v33 = vpop.f32.mrb[88].mxu1  ;;  %v1662_v34 = vpop.f32.mrb[89].mxu0 }
 0x34b   : > { %4472 = vtanh.f32 %v1743_v33  ;;  %v1745_v35 = vpop.f32.mrb[89].mxu1 }
 0x34c   : > { %4474 = vtanh.f32 %v1662_v34 }
 0x34d   : > { %4476 = vtanh.f32 %v1745_v35  ;;  %v1666_v36 = vpop.f32.mrb[90].mxu0 }
 0x34e   : > { %v1749_v38 = vpop.f32.mrb[90].mxu1  ;;  %v1668_v39 = vpop.f32.mrb[91].mxu0 }
 0x34f   : > { %v1751_v40 = vpop.f32.mrb[91].mxu1  ;;  %4478 = vtanh.f32 %v1668_v39 }
 0x350   : > { %v4463_v41 = vpop.eup %4462  ;;  %4480 = vtanh.f32 %v1751_v40 }
 0x351   : > { %v4465_v42 = vpop.eup %4464  ;;  %4482 = vtanh.f32 %v1666_v36 }
 0x352   : > { %v4467_v43 = vpop.eup %4466  ;;  %4484 = vtanh.f32 %v1749_v38 }
 0x353   : > { %v4469_v44 = vpop.eup %4468 }
 0x354   : > { %v4471_v45 = vpop.eup %4470 }
 0x355   : > { %v4473_v47 = vpop.eup %4472  ;;  %v3928_v48 = vpack.c.bf16 %v4471_v45, %v4463_v41 }
 0x356   : > { %v4475_v49 = vpop.eup %4474  ;;  %v3932_v50 = vpack.c.bf16 %v4473_v47, %v4465_v42 }
 0x357   : > { %v4477_v51 = vpop.eup %4476  ;;  %v3926_v52 = vpack.c.bf16 %v4475_v49, %v4467_v43 }
 0x358   : > { %v3930_v53 = vpack.c.bf16 %v4477_v51, %v4469_v44 }
 0x359   : > { %3927 = vmatprep.subr.bf16.mxu0 %v3926_v52  ;;  %v4479_v54 = vpop.eup %4478 }
 0x35a   : > { %3931 = vmatprep.subr.bf16.mxu1 %v3930_v53  ;;  %3929 = vmatpush1.bf16.msra.mxu0 %v3928_v48  ;;  %v4481_v55 = vpop.eup %4480 }
 0x35b   : > { %3933 = vmatpush1.bf16.msra.mxu1 %v3932_v50  ;;  %1948 = vmatprep.subr.mxu0 %v4479_v54  ;;  %v4483_v56 = vpop.eup %4482 }
 0x35c   : > { %2031 = vmatprep.subr.mxu1 %v4481_v55  ;;  %v4485_v57 = vpop.eup %4484 }
 0x35e   : > { %1949 = vmatpush1.msra.mxu0 %v4483_v56 }
 0x35f   : > { %2032 = vmatpush1.msra.mxu1 %v4485_v57  ;;  %3694 = vmatmul.mubr.msk.f32.vlgmr.msra.gmra.mrb[98].mxu0 %vm1400_vm1, %v5286_v22 }
 0x360   : > { %3697 = vmatmul.mubr.msk.f32.vlgmr.msra.gmra.mrb[98].mxu1 %vm1400_vm1, %v5286_v22  ;;  %2014 = vmatprep.mubr.f32.mxu0 %v4806_v0 }
 0x361   : > { %2097 = vmatprep.mubr.f32.mxu1 %v4806_v0 }
 0x363   : > { %3695 = vmatmul.mubr.msk.f32.gmra.mrb[100].mxu0 %vm1400_vm1, %v5296_v23 }
 0x364   : > { %3698 = vmatmul.mubr.msk.f32.gmra.mrb[100].mxu1 %vm1400_vm1, %v5296_v23  ;;  %2020 = vmatprep.mubr.f32.mxu0 %v4806_v0 }
 0x365   : > { %2103 = vmatprep.mubr.f32.mxu1 %v4806_v0 }
 0x367   : > { %3696 = vmatmul.mubr.msk.f32.gmra.mrb[102].mxu0 %vm1400_vm1, %v5307_v24 }
 0x368   : > { %3699 = vmatmul.mubr.msk.f32.gmra.mrb[102].mxu1 %vm1400_vm1, %v5307_v24  ;;  %2206 = vmatprep.mubr.f32.mxu0 %v4806_v0 }
 0x369   : > { %2319 = vmatprep.mubr.f32.mxu1 %v4806_v0 }
 0x3ee   : > { %v1844_v58 = vpop.f32.mrb[92].mxu0 }
 0x3ef   : > { %v1927_v59 = vpop.f32.mrb[92].mxu1  ;;  %v1846_v60 = vpop.f32.mrb[93].mxu0 }
 0x3f0   : > { %v1929_v61 = vpop.f32.mrb[93].mxu1 }
 0x3f2   : > { %v1850_v62 = vpop.f32.mrb[94].mxu0 }
 0x3f3   : > { %v3936_v63 = vpack.c.bf16 %v1850_v62, %v1844_v58  ;;  %v1933_v1 = vpop.f32.mrb[94].mxu1  ;;  %v1852_v2 = vpop.f32.mrb[95].mxu0 }
 0x3f4   : > { %v3940_v21 = vpack.c.bf16 %v1933_v1, %v1927_v59  ;;  %v3934_v25 = vpack.c.bf16 %v1852_v2, %v1846_v60  ;;  %v1935_v3 = vpop.f32.mrb[95].mxu1 }
 0x3f5   : > { %v3938_v32 = vpack.c.bf16 %v1935_v3, %v1929_v61 }
 0x3f6   : > { %3935 = vmatprep.subr.bf16.mxu0 %v3934_v25  ;;  %v1856_v4 = vpop.f32.mrb[96].mxu0 }
 0x3f7   : > { %3939 = vmatprep.subr.bf16.mxu1 %v3938_v32  ;;  %3937 = vmatpush1.bf16.msra.mxu0 %v3936_v63  ;;  %v1939_v5 = vpop.f32.mrb[96].mxu1  ;;  %v1858_v37 = vpop.f32.mrb[97].mxu0 }
 0x3f8   : > { %3941 = vmatpush1.bf16.msra.mxu1 %v3940_v21  ;;  %v1941_v6 = vpop.f32.mrb[97].mxu1  ;;  %2146 = vmatprep.subr.mxu0 %v1858_v37 }
 0x3f9   : > { %2259 = vmatprep.subr.mxu1 %v1941_v6 }
 0x3fb   : > { %2147 = vmatpush1.msra.mxu0 %v1856_v4 }
 0x3fc   : > { %2260 = vmatpush1.msra.mxu1 %v1939_v5  ;;  %3700 = vmatmul.mubr.msk.f32.vlgmr.msra.gmra.mrb[104].mxu0 %vm1400_vm1, %v5337_v46 }
 0x3fd   : > { %3708 = vmatmul.mubr.msk.f32.vlgmr.msra.gmra.mrb[104].mxu1 %vm1400_vm1, %v5337_v46  ;;  %2212 = vmatprep.mubr.f32.mxu0 %v4806_v0 }
 0x3fe   : > { %2325 = vmatprep.mubr.f32.mxu1 %v4806_v0 }
 0x400   : > { %3701 = vmatmul.mubr.msk.f32.gmra.mrb[106].mxu0 %vm1400_vm1, %v5347_v7 }
 0x401   : > { %3709 = vmatmul.mubr.msk.f32.gmra.mrb[106].mxu1 %vm1400_vm1, %v5347_v7  ;;  %2218 = vmatprep.mubr.f32.mxu0 %v4806_v0 }
 0x402   : > { %2331 = vmatprep.mubr.f32.mxu1 %v4806_v0 }
 0x404   : > { %3702 = vmatmul.mubr.msk.f32.gmra.mrb[108].mxu0 %vm1400_vm1, %v5358_v26 }
 0x405   : > { %3710 = vmatmul.mubr.msk.f32.gmra.mrb[108].mxu1 %vm1400_vm1, %v5358_v26  ;;  %2224 = vmatprep.mubr.f32.mxu0 %v4806_v0 }
 0x406   : > { %2337 = vmatprep.mubr.f32.mxu1 %v4806_v0 }
 0x408   : > { %3703 = vmatmul.mubr.msk.f32.gmra.mrb[110].mxu0 %vm1400_vm1, %v5369_v8 }
 0x409   : > { %3711 = vmatmul.mubr.msk.f32.gmra.mrb[110].mxu1 %vm1400_vm1, %v5369_v8  ;;  %2230 = vmatprep.mubr.f32.mxu0 %v4806_v0 }
 0x40a   : > { %2343 = vmatprep.mubr.f32.mxu1 %v4806_v0 }
 0x40c   : > { %3704 = vmatmul.mubr.msk.f32.gmra.mrb[112].mxu0 %vm1400_vm1, %v2114_v9 }
 0x40d   : > { %3712 = vmatmul.mubr.msk.f32.gmra.mrb[112].mxu1 %vm1400_vm1, %v2114_v9  ;;  %2236 = vmatprep.mubr.f32.mxu0 %v4806_v0 }
 0x40e   : > { %2349 = vmatprep.mubr.f32.mxu1 %v4806_v0 }
 0x410   : > { %3705 = vmatmul.mubr.msk.f32.gmra.mrb[114].mxu0 %vm1400_vm1, %v2115_v10 }
 0x411   : > { %3713 = vmatmul.mubr.msk.f32.gmra.mrb[114].mxu1 %vm1400_vm1, %v2115_v10  ;;  %2242 = vmatprep.mubr.f32.mxu0 %v4806_v0 }
 0x412   : > { %2355 = vmatprep.mubr.f32.mxu1 %v4806_v0 }
 0x414   : > { %3706 = vmatmul.mubr.msk.f32.gmra.mrb[116].mxu0 %vm1400_vm1, %v2116_v11 }
 0x415   : > { %3714 = vmatmul.mubr.msk.f32.gmra.mrb[116].mxu1 %vm1400_vm1, %v2116_v11  ;;  %2248 = vmatprep.mubr.f32.mxu0 %v4806_v0 }
 0x416   : > { %2361 = vmatprep.mubr.f32.mxu1 %v4806_v0 }
 0x418   : > { %3707 = vmatmul.mubr.msk.f32.gmra.mrb[118].mxu0 %vm1400_vm1, %v2117_v12 }
 0x419   : > { %3715 = vmatmul.mubr.msk.f32.gmra.mrb[118].mxu1 %vm1400_vm1, %v2117_v12  ;;  %2464 = vmatprep.mubr.f32.mxu0 %v4806_v0 }
 0x41a   : > { %2577 = vmatprep.mubr.f32.mxu1 %v4806_v0 }
 0x432   : > { %v2010_v13 = vpop.f32.mrb[98].mxu0 }
 0x433   : > { %v2093_v14 = vpop.f32.mrb[98].mxu1  ;;  %v2012_v15 = vpop.f32.mrb[99].mxu0 }
 0x434   : > { %v2095_v16 = vpop.f32.mrb[99].mxu1 }
 0x436   : > { %v2016_v17 = vpop.f32.mrb[100].mxu0 }
 0x437   : > { %v3944_v18 = vpack.c.bf16 %v2016_v17, %v2010_v13  ;;  %v2099_v19 = vpop.f32.mrb[100].mxu1  ;;  %v2018_v20 = vpop.f32.mrb[101].mxu0 }
 0x438   : > { %v3948_v22 = vpack.c.bf16 %v2099_v19, %v2093_v14  ;;  %v3942_v23 = vpack.c.bf16 %v2018_v20, %v2012_v15  ;;  %v2101_v24 = vpop.f32.mrb[101].mxu1 }
 0x439   : > { %v3946_v27 = vpack.c.bf16 %v2101_v24, %v2095_v16 }
 0x43a   : > { %3943 = vmatprep.subr.bf16.mxu0 %v3942_v23  ;;  %v2022_v28 = vpop.f32.mrb[102].mxu0 }
 0x43b   : > { %3947 = vmatprep.subr.bf16.mxu1 %v3946_v27  ;;  %3945 = vmatpush1.bf16.msra.mxu0 %v3944_v18  ;;  %v2105_v29 = vpop.f32.mrb[102].mxu1  ;;  %v2024_v30 = vpop.f32.mrb[103].mxu0 }
 0x43c   : > { %3949 = vmatpush1.bf16.msra.mxu1 %v3948_v22  ;;  %v2107_v31 = vpop.f32.mrb[103].mxu1  ;;  %2404 = vmatprep.subr.mxu0 %v2024_v30 }
 0x43d   : > { %2517 = vmatprep.subr.mxu1 %v2107_v31 }
 0x43f   : > { %2405 = vmatpush1.msra.mxu0 %v2022_v28 }
 0x440   : > { %2518 = vmatpush1.msra.mxu1 %v2105_v29  ;;  %3716 = vmatmul.mubr.msk.f32.vlgmr.msra.gmra.mrb[120].mxu0 %vm1400_vm1, %v5337_v46 }
 0x441   : > { %3724 = vmatmul.mubr.msk.f32.vlgmr.msra.gmra.mrb[120].mxu1 %vm1400_vm1, %v5337_v46  ;;  %2470 = vmatprep.mubr.f32.mxu0 %v4806_v0 }
 0x442   : > { %2583 = vmatprep.mubr.f32.mxu1 %v4806_v0 }
 0x444   : > { %3717 = vmatmul.mubr.msk.f32.gmra.mrb[122].mxu0 %vm1400_vm1, %v5347_v7 }
 0x445   : > { %3725 = vmatmul.mubr.msk.f32.gmra.mrb[122].mxu1 %vm1400_vm1, %v5347_v7  ;;  %2476 = vmatprep.mubr.f32.mxu0 %v4806_v0 }
 0x446   : > { %2589 = vmatprep.mubr.f32.mxu1 %v4806_v0 }
 0x448   : > { %3718 = vmatmul.mubr.msk.f32.gmra.mrb[124].mxu0 %vm1400_vm1, %v5358_v26 }
 0x449   : > { %3726 = vmatmul.mubr.msk.f32.gmra.mrb[124].mxu1 %vm1400_vm1, %v5358_v26  ;;  %2482 = vmatprep.mubr.f32.mxu0 %v4806_v0 }
 0x44a   : > { %2595 = vmatprep.mubr.f32.mxu1 %v4806_v0 }
 0x44c   : > { %3719 = vmatmul.mubr.msk.f32.gmra.mrb[126].mxu0 %vm1400_vm1, %v5369_v8 }
 0x44d   : > { %3727 = vmatmul.mubr.msk.f32.gmra.mrb[126].mxu1 %vm1400_vm1, %v5369_v8  ;;  %2488 = vmatprep.mubr.f32.mxu0 %v4806_v0 }
 0x44e   : > { %2601 = vmatprep.mubr.f32.mxu1 %v4806_v0 }
 0x450   : > { %3720 = vmatmul.mubr.msk.f32.gmra.mrb[128].mxu0 %vm1400_vm1, %v2114_v9 }
 0x451   : > { %3728 = vmatmul.mubr.msk.f32.gmra.mrb[128].mxu1 %vm1400_vm1, %v2114_v9  ;;  %2494 = vmatprep.mubr.f32.mxu0 %v4806_v0 }
 0x452   : > { %2607 = vmatprep.mubr.f32.mxu1 %v4806_v0 }
 0x454   : > { %3721 = vmatmul.mubr.msk.f32.gmra.mrb[130].mxu0 %vm1400_vm1, %v2115_v10 }
 0x455   : > { %3729 = vmatmul.mubr.msk.f32.gmra.mrb[130].mxu1 %vm1400_vm1, %v2115_v10  ;;  %2500 = vmatprep.mubr.f32.mxu0 %v4806_v0 }
 0x456   : > { %2613 = vmatprep.mubr.f32.mxu1 %v4806_v0 }
 0x458   : > { %3722 = vmatmul.mubr.msk.f32.gmra.mrb[132].mxu0 %vm1400_vm1, %v2116_v11 }
 0x459   : > { %3730 = vmatmul.mubr.msk.f32.gmra.mrb[132].mxu1 %vm1400_vm1, %v2116_v11  ;;  %2506 = vmatprep.mubr.f32.mxu0 %v4806_v0 }
 0x45a   : > { %2619 = vmatprep.mubr.f32.mxu1 %v4806_v0 }
 0x45c   : > { %3723 = vmatmul.mubr.msk.f32.gmra.mrb[134].mxu0 %vm1400_vm1, %v2117_v12 }
 0x45d   : > { %3731 = vmatmul.mubr.msk.f32.gmra.mrb[134].mxu1 %vm1400_vm1, %v2117_v12  ;;  %2755 = vmatprep.mubr.f32.mxu0 %v4806_v0 }
 0x45e   : > { %2868 = vmatprep.mubr.f32.mxu1 %v4806_v0 }
 0x4cf   : > { %v2208_v33 = vpop.f32.mrb[104].mxu0 }
 0x4d0   : > { %4486 = vtanh.f32 %v2208_v33  ;;  %v2321_v34 = vpop.f32.mrb[104].mxu1  ;;  %v2210_v35 = vpop.f32.mrb[105].mxu0 }
 0x4d1   : > { %4488 = vtanh.f32 %v2321_v34  ;;  %v2323_v36 = vpop.f32.mrb[105].mxu1 }
 0x4d2   : > { %4490 = vtanh.f32 %v2210_v35 }
 0x4d3   : > { %4492 = vtanh.f32 %v2323_v36  ;;  %v2214_v38 = vpop.f32.mrb[106].mxu0 }
 0x4d4   : > { %4494 = vtanh.f32 %v2214_v38  ;;  %v2327_v39 = vpop.f32.mrb[106].mxu1  ;;  %v2216_v40 = vpop.f32.mrb[107].mxu0 }
 0x4d5   : > { %4496 = vtanh.f32 %v2327_v39  ;;  %v2329_v41 = vpop.f32.mrb[107].mxu1 }
 0x4d6   : > { %4498 = vtanh.f32 %v2216_v40 }
 0x4d7   : > { %4500 = vtanh.f32 %v2329_v41  ;;  %v2220_v42 = vpop.f32.mrb[108].mxu0 }
 0x4d8   : > { %4502 = vtanh.f32 %v2220_v42  ;;  %v2333_v43 = vpop.f32.mrb[108].mxu1  ;;  %v2222_v44 = vpop.f32.mrb[109].mxu0 }
 0x4d9   : > { %4504 = vtanh.f32 %v2333_v43  ;;  %v2335_v45 = vpop.f32.mrb[109].mxu1 }
 0x4da   : > { %v4487_v47 = vpop.eup %4486  ;;  %4506 = vtanh.f32 %v2222_v44 }
 0x4db   : > { %v4489_v48 = vpop.eup %4488  ;;  %4508 = vtanh.f32 %v2335_v45  ;;  %v2226_v49 = vpop.f32.mrb[110].mxu0 }
 0x4dc   : > { %v4491_v50 = vpop.eup %4490  ;;  %4510 = vtanh.f32 %v2226_v49  ;;  %v2339_v51 = vpop.f32.mrb[110].mxu1 }
 0x4dd   : > { %v2228_v52 = vpop.f32.mrb[111].mxu0  ;;  %v4493_v53 = vpop.eup %4492  ;;  %4512 = vtanh.f32 %v2339_v51 }
 0x4de   : > { %v2341_v54 = vpop.f32.mrb[111].mxu1  ;;  %v4495_v55 = vpop.eup %4494  ;;  %4514 = vtanh.f32 %v2228_v52  ;;  %v5449_v52 = vld [vmem:[%s5645_s1 + $0x220] sm:$0xff] }
 0x4df   : > { %v4497_v56 = vpop.eup %4496  ;;  %4516 = vtanh.f32 %v2341_v54  ;;  %v2232_v57 = vpop.f32.mrb[112].mxu0  ;;  %v3952_v58 = vpack.c.bf16 %v4495_v55, %v4487_v47  ;;  %v5470_v54 = vld [vmem:[%s5645_s1 + $0x240] sm:$0xff]  ;;  %v5481_v55 = vld [vmem:[%s5645_s1 + $0x250] sm:$0xff] }
 0x4e0   : > { %v4499_v59 = vpop.eup %4498  ;;  %4518 = vtanh.f32 %v2232_v57  ;;  %v2345_v60 = vpop.f32.mrb[112].mxu1  ;;  %v3968_v62 = vpack.c.bf16 %v4497_v56, %v4489_v48  ;;  %v5492_v56 = vld [vmem:[%s5645_s1 + $0x260] sm:$0xff]  ;;  %v5503_v57 = vld [vmem:[%s5645_s1 + $0x270] sm:$0xff] }
 0x4e1   : > { %v2234_v61 = vpop.f32.mrb[113].mxu0  ;;  %v4501_v63 = vpop.eup %4500  ;;  %4520 = vtanh.f32 %v2345_v60  ;;  %v3950_v2 = vpack.c.bf16 %v4499_v59, %v4491_v50 }
 0x4e2   : > { %v2347_v1 = vpop.f32.mrb[113].mxu1  ;;  %v4503_v21 = vpop.eup %4502  ;;  %4522 = vtanh.f32 %v2234_v61  ;;  %v3966_v25 = vpack.c.bf16 %v4501_v63, %v4493_v53  ;;  %v5459_v53 = vld [vmem:[%s5645_s1 + $0x230] sm:$0xff]  ;;  %v5514_v61 = vld [vmem:[%s5645_s1 + $0x280] sm:$0xff] }
 0x4e3   : > { %v4505_v3 = vpop.eup %4504  ;;  %4524 = vtanh.f32 %v2347_v1  ;;  %3951 = vmatprep.subr.bf16.mxu0 %v3950_v2  ;;  %v2238_v32 = vpop.f32.mrb[114].mxu0 }
 0x4e4   : > { %v4507_v4 = vpop.eup %4506  ;;  %3967 = vmatprep.subr.bf16.mxu1 %v3966_v25  ;;  %4526 = vtanh.f32 %v2238_v32  ;;  %v2351_v5 = vpop.f32.mrb[114].mxu1  ;;  %3953 = vmatpush1.bf16.msra.mxu0 %v3952_v58 }
 0x4e5   : > { %v2240_v37 = vpop.f32.mrb[115].mxu0  ;;  %v4509_v6 = vpop.eup %4508  ;;  %4528 = vtanh.f32 %v2351_v5  ;;  %3969 = vmatpush1.bf16.msra.mxu1 %v3968_v62 }
 0x4e6   : > { %v2353_v46 = vpop.f32.mrb[115].mxu1  ;;  %v4511_v7 = vpop.eup %4510  ;;  %4530 = vtanh.f32 %v2240_v37 }
 0x4e7   : > { %v4513_v26 = vpop.eup %4512  ;;  %4532 = vtanh.f32 %v2353_v46  ;;  %v2244_v8 = vpop.f32.mrb[116].mxu0  ;;  %v3956_v9 = vpack.c.bf16 %v4511_v7, %v4503_v21  ;;  %v5525_v21 = vld [vmem:[%s5645_s1 + $0x290] sm:$0xff] }
 0x4e8   : > { %v4515_v10 = vpop.eup %4514  ;;  %4534 = vtanh.f32 %v2244_v8  ;;  %v2357_v11 = vpop.f32.mrb[116].mxu1  ;;  %v3972_v13 = vpack.c.bf16 %v4513_v26, %v4505_v3 }
 0x4e9   : > { %v2246_v12 = vpop.f32.mrb[117].mxu0  ;;  %v4517_v14 = vpop.eup %4516  ;;  %4536 = vtanh.f32 %v2357_v11  ;;  %v3954_v16 = vpack.c.bf16 %v4515_v10, %v4507_v4 }
 0x4ea   : > { %v2359_v15 = vpop.f32.mrb[117].mxu1  ;;  %v4519_v17 = vpop.eup %4518  ;;  %4538 = vtanh.f32 %v2246_v12  ;;  %v3970_v18 = vpack.c.bf16 %v4517_v14, %v4509_v6 }
 0x4eb   : > { %v4521_v19 = vpop.eup %4520  ;;  %4540 = vtanh.f32 %v2359_v15  ;;  %3955 = vmatprep.subr.bf16.mxu0 %v3954_v16  ;;  %v2250_v20 = vpop.f32.mrb[118].mxu0 }
 0x4ec   : > { %v4523_v22 = vpop.eup %4522  ;;  %3971 = vmatprep.subr.bf16.mxu1 %v3970_v18  ;;  %4542 = vtanh.f32 %v2250_v20  ;;  %v2363_v23 = vpop.f32.mrb[118].mxu1  ;;  %3957 = vmatpush1.bf16.msra.mxu0 %v3956_v9 }
 0x4ed   : > { %v2252_v24 = vpop.f32.mrb[119].mxu0  ;;  %v4525_v27 = vpop.eup %4524  ;;  %4544 = vtanh.f32 %v2363_v23  ;;  %3973 = vmatpush1.bf16.msra.mxu1 %v3972_v13 }
 0x4ee   : > { %v2365_v28 = vpop.f32.mrb[119].mxu1  ;;  %v4527_v29 = vpop.eup %4526  ;;  %4546 = vtanh.f32 %v2252_v24 }
 0x4ef   : > { %v4529_v30 = vpop.eup %4528  ;;  %4548 = vtanh.f32 %v2365_v28  ;;  %v3960_v31 = vpack.c.bf16 %v4527_v29, %v4519_v17 }
 0x4f0   : > { %v4531_v33 = vpop.eup %4530  ;;  %v3976_v34 = vpack.c.bf16 %v4529_v30, %v4521_v19 }
 0x4f1   : > { %v4533_v35 = vpop.eup %4532  ;;  %v3958_v36 = vpack.c.bf16 %v4531_v33, %v4523_v22 }
 0x4f2   : > { %v4535_v38 = vpop.eup %4534  ;;  %v3974_v39 = vpack.c.bf16 %v4533_v35, %v4525_v27 }
 0x4f3   : > { %v4537_v40 = vpop.eup %4536  ;;  %3959 = vmatprep.subr.bf16.mxu0 %v3958_v36 }
 0x4f4   : > { %v4539_v41 = vpop.eup %4538  ;;  %3975 = vmatprep.subr.bf16.mxu1 %v3974_v39  ;;  %3961 = vmatpush1.bf16.msra.mxu0 %v3960_v31 }
 0x4f5   : > { %v4541_v42 = vpop.eup %4540  ;;  %3977 = vmatpush1.bf16.msra.mxu1 %v3976_v34 }
 0x4f6   : > { %v4543_v43 = vpop.eup %4542 }
 0x4f7   : > { %v4545_v44 = vpop.eup %4544  ;;  %v3964_v45 = vpack.c.bf16 %v4543_v43, %v4535_v38 }
 0x4f8   : > { %v4547_v47 = vpop.eup %4546  ;;  %v3980_v48 = vpack.c.bf16 %v4545_v44, %v4537_v40 }
 0x4f9   : > { %v4549_v49 = vpop.eup %4548  ;;  %v3962_v50 = vpack.c.bf16 %v4547_v47, %v4539_v41 }
 0x4fa   : > { %v3978_v51 = vpack.c.bf16 %v4549_v49, %v4541_v42 }
 0x4fb   : > { %3963 = vmatprep.subr.bf16.mxu0 %v3962_v50 }
 0x4fc   : > { %3979 = vmatprep.subr.bf16.mxu1 %v3978_v51  ;;  %3965 = vmatpush1.bf16.msra.mxu0 %v3964_v45 }
 0x4fd   : > { %3981 = vmatpush1.bf16.msra.mxu1 %v3980_v48 }
 0x4ff   : > { %3732 = vmatmul.mubr.msk.f32.vlgmr.msra.gmra.mrb[136].mxu0 %vm2666_vm2, %v5449_v52 }
 0x500   : > { %3740 = vmatmul.mubr.msk.f32.vlgmr.msra.gmra.mrb[136].mxu1 %vm2666_vm2, %v5449_v52  ;;  %2761 = vmatprep.mubr.f32.mxu0 %v4806_v0 }
 0x501   : > { %2874 = vmatprep.mubr.f32.mxu1 %v4806_v0 }
 0x503   : > { %3733 = vmatmul.mubr.msk.f32.gmra.mrb[138].mxu0 %vm2666_vm2, %v5459_v53 }
 0x504   : > { %3741 = vmatmul.mubr.msk.f32.gmra.mrb[138].mxu1 %vm2666_vm2, %v5459_v53  ;;  %2767 = vmatprep.mubr.f32.mxu0 %v4806_v0 }
 0x505   : > { %2880 = vmatprep.mubr.f32.mxu1 %v4806_v0 }
 0x507   : > { %3734 = vmatmul.mubr.msk.f32.gmra.mrb[140].mxu0 %vm2666_vm2, %v5470_v54 }
 0x508   : > { %3742 = vmatmul.mubr.msk.f32.gmra.mrb[140].mxu1 %vm2666_vm2, %v5470_v54  ;;  %2773 = vmatprep.mubr.f32.mxu0 %v4806_v0 }
 0x509   : > { %2886 = vmatprep.mubr.f32.mxu1 %v4806_v0 }
 0x50b   : > { %3735 = vmatmul.mubr.msk.f32.gmra.mrb[142].mxu0 %vm2666_vm2, %v5481_v55 }
 0x50c   : > { %3743 = vmatmul.mubr.msk.f32.gmra.mrb[142].mxu1 %vm2666_vm2, %v5481_v55  ;;  %2779 = vmatprep.mubr.f32.mxu0 %v4806_v0 }
 0x50d   : > { %2892 = vmatprep.mubr.f32.mxu1 %v4806_v0 }
 0x50f   : > { %3736 = vmatmul.mubr.msk.f32.gmra.mrb[144].mxu0 %vm2666_vm2, %v5492_v56 }
 0x510   : > { %3744 = vmatmul.mubr.msk.f32.gmra.mrb[144].mxu1 %vm2666_vm2, %v5492_v56  ;;  %2785 = vmatprep.mubr.f32.mxu0 %v4806_v0 }
 0x511   : > { %2898 = vmatprep.mubr.f32.mxu1 %v4806_v0 }
 0x513   : > { %v2466_v58 = vpop.f32.mrb[120].mxu0  ;;  %3737 = vmatmul.mubr.msk.f32.gmra.mrb[146].mxu0 %vm2666_vm2, %v5503_v57 }
 0x514   : > { %4550 = vtanh.f32 %v2466_v58  ;;  %v2579_v59 = vpop.f32.mrb[120].mxu1  ;;  %v2468_v60 = vpop.f32.mrb[121].mxu0  ;;  %3745 = vmatmul.mubr.msk.f32.gmra.mrb[146].mxu1 %vm2666_vm2, %v5503_v57  ;;  %2791 = vmatprep.mubr.f32.mxu0 %v4806_v0 }
 0x515   : > { %4552 = vtanh.f32 %v2579_v59  ;;  %v2581_v62 = vpop.f32.mrb[121].mxu1  ;;  %2904 = vmatprep.mubr.f32.mxu1 %v4806_v0 }
 0x516   : > { %4554 = vtanh.f32 %v2468_v60 }
 0x517   : > { %4556 = vtanh.f32 %v2581_v62  ;;  %v2472_v63 = vpop.f32.mrb[122].mxu0  ;;  %3738 = vmatmul.mubr.msk.f32.gmra.mrb[148].mxu0 %vm2666_vm2, %v5514_v61 }
 0x518   : > { %4558 = vtanh.f32 %v2472_v63  ;;  %v2585_v1 = vpop.f32.mrb[122].mxu1  ;;  %v2474_v2 = vpop.f32.mrb[123].mxu0  ;;  %3746 = vmatmul.mubr.msk.f32.gmra.mrb[148].mxu1 %vm2666_vm2, %v5514_v61  ;;  %2797 = vmatprep.mubr.f32.mxu0 %v4806_v0 }
 0x519   : > { %4560 = vtanh.f32 %v2585_v1  ;;  %v2587_v25 = vpop.f32.mrb[123].mxu1  ;;  %2910 = vmatprep.mubr.f32.mxu1 %v4806_v0 }
 0x51a   : > { %4562 = vtanh.f32 %v2474_v2 }
 0x51b   : > { %4564 = vtanh.f32 %v2587_v25  ;;  %v2478_v3 = vpop.f32.mrb[124].mxu0  ;;  %3739 = vmatmul.mubr.msk.f32.gmra.mrb[150].mxu0 %vm2666_vm2, %v5525_v21 }
 0x51c   : > { %4566 = vtanh.f32 %v2478_v3  ;;  %v2591_v32 = vpop.f32.mrb[124].mxu1  ;;  %v2480_v4 = vpop.f32.mrb[125].mxu0  ;;  %3747 = vmatmul.mubr.msk.f32.gmra.mrb[150].mxu1 %vm2666_vm2, %v5525_v21  ;;  %3013 = vmatprep.mubr.f32.mxu0 %v4806_v0 }
 0x51d   : > { %4568 = vtanh.f32 %v2591_v32  ;;  %v2593_v5 = vpop.f32.mrb[125].mxu1  ;;  %3126 = vmatprep.mubr.f32.mxu1 %v4806_v0 }
 0x51e   : > { %v4551_v37 = vpop.eup %4550  ;;  %4570 = vtanh.f32 %v2480_v4 }
 0x51f   : > { %v4553_v6 = vpop.eup %4552  ;;  %4572 = vtanh.f32 %v2593_v5  ;;  %v2484_v46 = vpop.f32.mrb[126].mxu0 }
 0x520   : > { %v4555_v7 = vpop.eup %4554  ;;  %4574 = vtanh.f32 %v2484_v46  ;;  %v2597_v26 = vpop.f32.mrb[126].mxu1 }
 0x521   : > { %v2486_v8 = vpop.f32.mrb[127].mxu0  ;;  %v4557_v9 = vpop.eup %4556  ;;  %4576 = vtanh.f32 %v2597_v26 }
 0x522   : > { %v2599_v10 = vpop.f32.mrb[127].mxu1  ;;  %v4559_v11 = vpop.eup %4558  ;;  %4578 = vtanh.f32 %v2486_v8 }
 0x523   : > { %v4561_v12 = vpop.eup %4560  ;;  %4580 = vtanh.f32 %v2599_v10  ;;  %v2490_v13 = vpop.f32.mrb[128].mxu0  ;;  %v3984_v14 = vpack.c.bf16 %v4559_v11, %v4551_v37 }
 0x524   : > { %v4563_v15 = vpop.eup %4562  ;;  %4582 = vtanh.f32 %v2490_v13  ;;  %v2603_v16 = vpop.f32.mrb[128].mxu1  ;;  %v4000_v18 = vpack.c.bf16 %v4561_v12, %v4553_v6 }
 0x525   : > { %v2492_v17 = vpop.f32.mrb[129].mxu0  ;;  %v4565_v19 = vpop.eup %4564  ;;  %4584 = vtanh.f32 %v2603_v16  ;;  %v3982_v22 = vpack.c.bf16 %v4563_v15, %v4555_v7 }
 0x526   : > { %v2605_v20 = vpop.f32.mrb[129].mxu1  ;;  %v4567_v23 = vpop.eup %4566  ;;  %4586 = vtanh.f32 %v2492_v17  ;;  %v3998_v24 = vpack.c.bf16 %v4565_v19, %v4557_v9 }
 0x527   : > { %v4569_v27 = vpop.eup %4568  ;;  %4588 = vtanh.f32 %v2605_v20  ;;  %3983 = vmatprep.subr.bf16.mxu0 %v3982_v22  ;;  %v2496_v28 = vpop.f32.mrb[130].mxu0 }
 0x528   : > { %v4571_v29 = vpop.eup %4570  ;;  %3999 = vmatprep.subr.bf16.mxu1 %v3998_v24  ;;  %4590 = vtanh.f32 %v2496_v28  ;;  %v2609_v30 = vpop.f32.mrb[130].mxu1  ;;  %3985 = vmatpush1.bf16.msra.mxu0 %v3984_v14 }
 0x529   : > { %v2498_v31 = vpop.f32.mrb[131].mxu0  ;;  %v4573_v33 = vpop.eup %4572  ;;  %4592 = vtanh.f32 %v2609_v30  ;;  %4001 = vmatpush1.bf16.msra.mxu1 %v4000_v18 }
 0x52a   : > { %v2611_v34 = vpop.f32.mrb[131].mxu1  ;;  %v4575_v35 = vpop.eup %4574  ;;  %4594 = vtanh.f32 %v2498_v31 }
 0x52b   : > { %v4577_v36 = vpop.eup %4576  ;;  %4596 = vtanh.f32 %v2611_v34  ;;  %v2502_v38 = vpop.f32.mrb[132].mxu0  ;;  %v3988_v39 = vpack.c.bf16 %v4575_v35, %v4567_v23 }
 0x52c   : > { %v4579_v40 = vpop.eup %4578  ;;  %4598 = vtanh.f32 %v2502_v38  ;;  %v2615_v41 = vpop.f32.mrb[132].mxu1  ;;  %v4004_v43 = vpack.c.bf16 %v4577_v36, %v4569_v27 }
 0x52d   : > { %v2504_v42 = vpop.f32.mrb[133].mxu0  ;;  %v4581_v44 = vpop.eup %4580  ;;  %4600 = vtanh.f32 %v2615_v41  ;;  %v3986_v47 = vpack.c.bf16 %v4579_v40, %v4571_v29 }
 0x52e   : > { %v2617_v45 = vpop.f32.mrb[133].mxu1  ;;  %v4583_v48 = vpop.eup %4582  ;;  %4602 = vtanh.f32 %v2504_v42  ;;  %v4002_v49 = vpack.c.bf16 %v4581_v44, %v4573_v33 }
 0x52f   : > { %v4585_v50 = vpop.eup %4584  ;;  %4604 = vtanh.f32 %v2617_v45  ;;  %3987 = vmatprep.subr.bf16.mxu0 %v3986_v47  ;;  %v2508_v51 = vpop.f32.mrb[134].mxu0 }
 0x530   : > { %v4587_v58 = vpop.eup %4586  ;;  %4003 = vmatprep.subr.bf16.mxu1 %v4002_v49  ;;  %4606 = vtanh.f32 %v2508_v51  ;;  %v2621_v59 = vpop.f32.mrb[134].mxu1  ;;  %3989 = vmatpush1.bf16.msra.mxu0 %v3988_v39 }
 0x531   : > { %v2510_v60 = vpop.f32.mrb[135].mxu0  ;;  %v4589_v62 = vpop.eup %4588  ;;  %4608 = vtanh.f32 %v2621_v59  ;;  %4005 = vmatpush1.bf16.msra.mxu1 %v4004_v43 }
 0x532   : > { %v2623_v63 = vpop.f32.mrb[135].mxu1  ;;  %v4591_v1 = vpop.eup %4590  ;;  %4610 = vtanh.f32 %v2510_v60 }
 0x533   : > { %v4593_v2 = vpop.eup %4592  ;;  %4612 = vtanh.f32 %v2623_v63  ;;  %v3992_v25 = vpack.c.bf16 %v4591_v1, %v4583_v48 }
 0x534   : > { %v4595_v3 = vpop.eup %4594  ;;  %v4008_v32 = vpack.c.bf16 %v4593_v2, %v4585_v50 }
 0x535   : > { %v4597_v4 = vpop.eup %4596  ;;  %v3990_v5 = vpack.c.bf16 %v4595_v3, %v4587_v58 }
 0x536   : > { %v4599_v37 = vpop.eup %4598  ;;  %v4006_v6 = vpack.c.bf16 %v4597_v4, %v4589_v62 }
 0x537   : > { %v4601_v46 = vpop.eup %4600  ;;  %3991 = vmatprep.subr.bf16.mxu0 %v3990_v5 }
 0x538   : > { %v4603_v7 = vpop.eup %4602  ;;  %4007 = vmatprep.subr.bf16.mxu1 %v4006_v6  ;;  %3993 = vmatpush1.bf16.msra.mxu0 %v3992_v25 }
 0x539   : > { %v4605_v26 = vpop.eup %4604  ;;  %4009 = vmatpush1.bf16.msra.mxu1 %v4008_v32 }
 0x53a   : > { %v4607_v8 = vpop.eup %4606 }
 0x53b   : > { %v4609_v9 = vpop.eup %4608  ;;  %v3996_v10 = vpack.c.bf16 %v4607_v8, %v4599_v37 }
 0x53c   : > { %v4611_v11 = vpop.eup %4610  ;;  %v4012_v12 = vpack.c.bf16 %v4609_v9, %v4601_v46 }
 0x53d   : > { %v4613_v13 = vpop.eup %4612  ;;  %v3994_v14 = vpack.c.bf16 %v4611_v11, %v4603_v7 }
 0x53e   : > { %v4010_v15 = vpack.c.bf16 %v4613_v13, %v4605_v26 }
 0x53f   : > { %3995 = vmatprep.subr.bf16.mxu0 %v3994_v14 }
 0x540   : > { %4011 = vmatprep.subr.bf16.mxu1 %v4010_v15  ;;  %3997 = vmatpush1.bf16.msra.mxu0 %v3996_v10 }
 0x541   : > { %4013 = vmatpush1.bf16.msra.mxu1 %v4012_v12 }
 0x543   : > { %3748 = vmatmul.mubr.msk.f32.vlgmr.msra.gmra.mrb[152].mxu0 %vm2666_vm2, %v5449_v52 }
 0x544   : > { %3756 = vmatmul.mubr.msk.f32.vlgmr.msra.gmra.mrb[152].mxu1 %vm2666_vm2, %v5449_v52  ;;  %3019 = vmatprep.mubr.f32.mxu0 %v4806_v0 }
 0x545   : > { %3132 = vmatprep.mubr.f32.mxu1 %v4806_v0 }
 0x547   : > { %3749 = vmatmul.mubr.msk.f32.gmra.mrb[154].mxu0 %vm2666_vm2, %v5459_v53 }
 0x548   : > { %3757 = vmatmul.mubr.msk.f32.gmra.mrb[154].mxu1 %vm2666_vm2, %v5459_v53  ;;  %3025 = vmatprep.mubr.f32.mxu0 %v4806_v0 }
 0x549   : > { %3138 = vmatprep.mubr.f32.mxu1 %v4806_v0 }
 0x54b   : > { %3750 = vmatmul.mubr.msk.f32.gmra.mrb[156].mxu0 %vm2666_vm2, %v5470_v54 }
 0x54c   : > { %3758 = vmatmul.mubr.msk.f32.gmra.mrb[156].mxu1 %vm2666_vm2, %v5470_v54  ;;  %3031 = vmatprep.mubr.f32.mxu0 %v4806_v0 }
 0x54d   : > { %3144 = vmatprep.mubr.f32.mxu1 %v4806_v0 }
 0x54f   : > { %3751 = vmatmul.mubr.msk.f32.gmra.mrb[158].mxu0 %vm2666_vm2, %v5481_v55 }
 0x550   : > { %3759 = vmatmul.mubr.msk.f32.gmra.mrb[158].mxu1 %vm2666_vm2, %v5481_v55  ;;  %3037 = vmatprep.mubr.f32.mxu0 %v4806_v0 }
 0x551   : > { %3150 = vmatprep.mubr.f32.mxu1 %v4806_v0 }
 0x553   : > { %3752 = vmatmul.mubr.msk.f32.gmra.mrb[160].mxu0 %vm2666_vm2, %v5492_v56 }
 0x554   : > { %3760 = vmatmul.mubr.msk.f32.gmra.mrb[160].mxu1 %vm2666_vm2, %v5492_v56  ;;  %3043 = vmatprep.mubr.f32.mxu0 %v4806_v0 }
 0x555   : > { %3156 = vmatprep.mubr.f32.mxu1 %v4806_v0 }
 0x557   : > { %3753 = vmatmul.mubr.msk.f32.gmra.mrb[162].mxu0 %vm2666_vm2, %v5503_v57 }
 0x558   : > { %3761 = vmatmul.mubr.msk.f32.gmra.mrb[162].mxu1 %vm2666_vm2, %v5503_v57  ;;  %3049 = vmatprep.mubr.f32.mxu0 %v4806_v0 }
 0x559   : > { %3162 = vmatprep.mubr.f32.mxu1 %v4806_v0 }
 0x55b   : > { %3754 = vmatmul.mubr.msk.f32.gmra.mrb[164].mxu0 %vm2666_vm2, %v5514_v61 }
 0x55c   : > { %3762 = vmatmul.mubr.msk.f32.gmra.mrb[164].mxu1 %vm2666_vm2, %v5514_v61  ;;  %3055 = vmatprep.mubr.f32.mxu0 %v4806_v0 }
 0x55d   : > { %3168 = vmatprep.mubr.f32.mxu1 %v4806_v0 }
 0x55f   : > { %3755 = vmatmul.mubr.msk.f32.gmra.mrb[166].mxu0 %vm2666_vm2, %v5525_v21 }
 0x560   : > { %3763 = vmatmul.mubr.msk.f32.gmra.mrb[166].mxu1 %vm2666_vm2, %v5525_v21  ;;  %3275 = vmatprep.mubr.f32.mxu0 %v4806_v0 }
 0x561   : > { %3346 = vmatprep.mubr.f32.mxu1 %v4806_v0 }
 0x5d2   : > { %v2757_v52 = vpop.f32.mrb[136].mxu0 }
 0x5d3   : > { %4614 = vtanh.f32 %v2757_v52  ;;  %v2870_v53 = vpop.f32.mrb[136].mxu1  ;;  %v2759_v54 = vpop.f32.mrb[137].mxu0 }
 0x5d4   : > { %4616 = vtanh.f32 %v2870_v53  ;;  %v2872_v55 = vpop.f32.mrb[137].mxu1 }
 0x5d5   : > { %4618 = vtanh.f32 %v2759_v54 }
 0x5d6   : > { %4620 = vtanh.f32 %v2872_v55  ;;  %v2763_v56 = vpop.f32.mrb[138].mxu0 }
 0x5d7   : > { %4622 = vtanh.f32 %v2763_v56  ;;  %v2876_v57 = vpop.f32.mrb[138].mxu1  ;;  %v2765_v61 = vpop.f32.mrb[139].mxu0 }
 0x5d8   : > { %4624 = vtanh.f32 %v2876_v57  ;;  %v2878_v16 = vpop.f32.mrb[139].mxu1 }
 0x5d9   : > { %4626 = vtanh.f32 %v2765_v61 }
 0x5da   : > { %4628 = vtanh.f32 %v2878_v16  ;;  %v2769_v21 = vpop.f32.mrb[140].mxu0 }
 0x5db   : > { %4630 = vtanh.f32 %v2769_v21  ;;  %v2882_v17 = vpop.f32.mrb[140].mxu1  ;;  %v2771_v18 = vpop.f32.mrb[141].mxu0 }
 0x5dc   : > { %4632 = vtanh.f32 %v2882_v17  ;;  %v2884_v19 = vpop.f32.mrb[141].mxu1 }
 0x5dd   : > { %v4615_v20 = vpop.eup %4614  ;;  %4634 = vtanh.f32 %v2771_v18 }
 0x5de   : > { %v4617_v22 = vpop.eup %4616  ;;  %4636 = vtanh.f32 %v2884_v19  ;;  %v2775_v23 = vpop.f32.mrb[142].mxu0 }
 0x5df   : > { %v4619_v24 = vpop.eup %4618  ;;  %4638 = vtanh.f32 %v2775_v23  ;;  %v2888_v27 = vpop.f32.mrb[142].mxu1 }
 0x5e0   : > { %v2777_v28 = vpop.f32.mrb[143].mxu0  ;;  %v4621_v29 = vpop.eup %4620  ;;  %4640 = vtanh.f32 %v2888_v27 }
 0x5e1   : > { %v2890_v30 = vpop.f32.mrb[143].mxu1  ;;  %v4623_v31 = vpop.eup %4622  ;;  %4642 = vtanh.f32 %v2777_v28  ;;  %v5585_v28 = vld [vmem:[%s5645_s1 + $0x2a0] sm:$0x7] }
 0x5e2   : > { %v4625_v33 = vpop.eup %4624  ;;  %4644 = vtanh.f32 %v2890_v30  ;;  %v2781_v34 = vpop.f32.mrb[144].mxu0  ;;  %v4016_v35 = vpack.c.bf16 %v4623_v31, %v4615_v20 }
 0x5e3   : > { %v4627_v36 = vpop.eup %4626  ;;  %4646 = vtanh.f32 %v2781_v34  ;;  %v2894_v38 = vpop.f32.mrb[144].mxu1  ;;  %v4032_v40 = vpack.c.bf16 %v4625_v33, %v4617_v22 }
 0x5e4   : > { %v2783_v39 = vpop.f32.mrb[145].mxu0  ;;  %v4629_v41 = vpop.eup %4628  ;;  %4648 = vtanh.f32 %v2894_v38  ;;  %v4014_v43 = vpack.c.bf16 %v4627_v36, %v4619_v24 }
 0x5e5   : > { %v2896_v42 = vpop.f32.mrb[145].mxu1  ;;  %v4631_v44 = vpop.eup %4630  ;;  %4650 = vtanh.f32 %v2783_v39  ;;  %v4030_v45 = vpack.c.bf16 %v4629_v41, %v4621_v29 }
 0x5e6   : > { %v4633_v47 = vpop.eup %4632  ;;  %4652 = vtanh.f32 %v2896_v42  ;;  %4015 = vmatprep.subr.bf16.mxu0 %v4014_v43  ;;  %v2787_v48 = vpop.f32.mrb[146].mxu0 }
 0x5e7   : > { %v4635_v49 = vpop.eup %4634  ;;  %4031 = vmatprep.subr.bf16.mxu1 %v4030_v45  ;;  %4654 = vtanh.f32 %v2787_v48  ;;  %v2900_v50 = vpop.f32.mrb[146].mxu1  ;;  %4017 = vmatpush1.bf16.msra.mxu0 %v4016_v35 }
 0x5e8   : > { %v2789_v51 = vpop.f32.mrb[147].mxu0  ;;  %v4637_v58 = vpop.eup %4636  ;;  %4656 = vtanh.f32 %v2900_v50  ;;  %4033 = vmatpush1.bf16.msra.mxu1 %v4032_v40 }
 0x5e9   : > { %v2902_v59 = vpop.f32.mrb[147].mxu1  ;;  %v4639_v60 = vpop.eup %4638  ;;  %4658 = vtanh.f32 %v2789_v51 }
 0x5ea   : > { %v4641_v62 = vpop.eup %4640  ;;  %4660 = vtanh.f32 %v2902_v59  ;;  %v2793_v63 = vpop.f32.mrb[148].mxu0  ;;  %v4020_v1 = vpack.c.bf16 %v4639_v60, %v4631_v44 }
 0x5eb   : > { %v4643_v2 = vpop.eup %4642  ;;  %4662 = vtanh.f32 %v2793_v63  ;;  %v2906_v25 = vpop.f32.mrb[148].mxu1  ;;  %v4036_v32 = vpack.c.bf16 %v4641_v62, %v4633_v47 }
 0x5ec   : > { %v2795_v3 = vpop.f32.mrb[149].mxu0  ;;  %v4645_v4 = vpop.eup %4644  ;;  %4664 = vtanh.f32 %v2906_v25  ;;  %v4018_v37 = vpack.c.bf16 %v4643_v2, %v4635_v49 }
 0x5ed   : > { %v2908_v5 = vpop.f32.mrb[149].mxu1  ;;  %v4647_v6 = vpop.eup %4646  ;;  %4666 = vtanh.f32 %v2795_v3  ;;  %v4034_v46 = vpack.c.bf16 %v4645_v4, %v4637_v58 }
 0x5ee   : > { %v4649_v7 = vpop.eup %4648  ;;  %4668 = vtanh.f32 %v2908_v5  ;;  %4019 = vmatprep.subr.bf16.mxu0 %v4018_v37  ;;  %v2799_v26 = vpop.f32.mrb[150].mxu0 }
 0x5ef   : > { %v4651_v8 = vpop.eup %4650  ;;  %4035 = vmatprep.subr.bf16.mxu1 %v4034_v46  ;;  %4670 = vtanh.f32 %v2799_v26  ;;  %v2912_v9 = vpop.f32.mrb[150].mxu1  ;;  %4021 = vmatpush1.bf16.msra.mxu0 %v4020_v1 }
 0x5f0   : > { %v2801_v10 = vpop.f32.mrb[151].mxu0  ;;  %v4653_v11 = vpop.eup %4652  ;;  %4672 = vtanh.f32 %v2912_v9  ;;  %4037 = vmatpush1.bf16.msra.mxu1 %v4036_v32 }
 0x5f1   : > { %v2914_v12 = vpop.f32.mrb[151].mxu1  ;;  %v4655_v13 = vpop.eup %4654  ;;  %4674 = vtanh.f32 %v2801_v10 }
 0x5f2   : > { %v4657_v14 = vpop.eup %4656  ;;  %4676 = vtanh.f32 %v2914_v12  ;;  %v4024_v15 = vpack.c.bf16 %v4655_v13, %v4647_v6 }
 0x5f3   : > { %v4659_v52 = vpop.eup %4658  ;;  %v4040_v53 = vpack.c.bf16 %v4657_v14, %v4649_v7 }
 0x5f4   : > { %v4661_v54 = vpop.eup %4660  ;;  %v4022_v55 = vpack.c.bf16 %v4659_v52, %v4651_v8 }
 0x5f5   : > { %v4663_v56 = vpop.eup %4662  ;;  %v4038_v57 = vpack.c.bf16 %v4661_v54, %v4653_v11 }
 0x5f6   : > { %v4665_v61 = vpop.eup %4664  ;;  %4023 = vmatprep.subr.bf16.mxu0 %v4022_v55 }
 0x5f7   : > { %v4667_v16 = vpop.eup %4666  ;;  %4039 = vmatprep.subr.bf16.mxu1 %v4038_v57  ;;  %4025 = vmatpush1.bf16.msra.mxu0 %v4024_v15 }
 0x5f8   : > { %v4669_v21 = vpop.eup %4668  ;;  %4041 = vmatpush1.bf16.msra.mxu1 %v4040_v53 }
 0x5f9   : > { %v4671_v17 = vpop.eup %4670 }
 0x5fa   : > { %v4673_v18 = vpop.eup %4672  ;;  %v4028_v19 = vpack.c.bf16 %v4671_v17, %v4663_v56 }
 0x5fb   : > { %v4675_v20 = vpop.eup %4674  ;;  %v4044_v22 = vpack.c.bf16 %v4673_v18, %v4665_v61 }
 0x5fc   : > { %v4677_v23 = vpop.eup %4676  ;;  %v4026_v24 = vpack.c.bf16 %v4675_v20, %v4667_v16 }
 0x5fd   : > { %v4042_v27 = vpack.c.bf16 %v4677_v23, %v4669_v21 }
 0x5fe   : > { %4027 = vmatprep.subr.bf16.mxu0 %v4026_v24 }
 0x5ff   : > { %4043 = vmatprep.subr.bf16.mxu1 %v4042_v27  ;;  %4029 = vmatpush1.bf16.msra.mxu0 %v4028_v19 }
 0x600   : > { %4045 = vmatpush1.bf16.msra.mxu1 %v4044_v22 }
 0x602   : > { %3764 = vmatmul.mubr.msk.f32.vlgmr.msra.gmra.mrb[168].mxu0 %vm2666_vm2, %v5585_v28 }
 0x603   : > { %3765 = vmatmul.mubr.msk.f32.vlgmr.msra.gmra.mrb[168].mxu1 %vm2666_vm2, %v5585_v28  ;;  %3417 = vmatprep.mubr.f32.mxu0 %v4806_v0 }
 0x604   : > { %3488 = vmatprep.mubr.f32.mxu1 %v4806_v0 }
 0x616   : > { %v3015_v29 = vpop.f32.mrb[152].mxu0 }
 0x617   : > { %4678 = vtanh.f32 %v3015_v29  ;;  %v3128_v30 = vpop.f32.mrb[152].mxu1  ;;  %v3017_v31 = vpop.f32.mrb[153].mxu0 }
 0x618   : > { %4680 = vtanh.f32 %v3128_v30  ;;  %v3130_v33 = vpop.f32.mrb[153].mxu1 }
 0x619   : > { %4682 = vtanh.f32 %v3017_v31 }
 0x61a   : > { %4684 = vtanh.f32 %v3130_v33  ;;  %v3021_v34 = vpop.f32.mrb[154].mxu0 }
 0x61b   : > { %4686 = vtanh.f32 %v3021_v34  ;;  %v3134_v35 = vpop.f32.mrb[154].mxu1  ;;  %v3023_v36 = vpop.f32.mrb[155].mxu0 }
 0x61c   : > { %4688 = vtanh.f32 %v3134_v35  ;;  %v3136_v38 = vpop.f32.mrb[155].mxu1 }
 0x61d   : > { %4690 = vtanh.f32 %v3023_v36 }
 0x61e   : > { %4692 = vtanh.f32 %v3136_v38  ;;  %v3027_v39 = vpop.f32.mrb[156].mxu0 }
 0x61f   : > { %4694 = vtanh.f32 %v3027_v39  ;;  %v3140_v40 = vpop.f32.mrb[156].mxu1  ;;  %v3029_v0 = vpop.f32.mrb[157].mxu0 }
 0x620   : > { %4696 = vtanh.f32 %v3140_v40  ;;  %v3142_v41 = vpop.f32.mrb[157].mxu1 }
 0x621   : > { %v4679_v42 = vpop.eup %4678  ;;  %4698 = vtanh.f32 %v3029_v0 }
 0x622   : > { %v4681_v43 = vpop.eup %4680  ;;  %4700 = vtanh.f32 %v3142_v41  ;;  %v3033_v44 = vpop.f32.mrb[158].mxu0 }
 0x623   : > { %v4683_v45 = vpop.eup %4682  ;;  %4702 = vtanh.f32 %v3033_v44  ;;  %v3146_v47 = vpop.f32.mrb[158].mxu1 }
 0x624   : > { %v3035_v48 = vpop.f32.mrb[159].mxu0  ;;  %v4685_v49 = vpop.eup %4684  ;;  %4704 = vtanh.f32 %v3146_v47 }
 0x625   : > { %v3148_v50 = vpop.f32.mrb[159].mxu1  ;;  %v4687_v51 = vpop.eup %4686  ;;  %4706 = vtanh.f32 %v3035_v48 }
 0x626   : > { %v4689_v58 = vpop.eup %4688  ;;  %4708 = vtanh.f32 %v3148_v50  ;;  %v3039_v59 = vpop.f32.mrb[160].mxu0  ;;  %v4048_v60 = vpack.c.bf16 %v4687_v51, %v4679_v42 }
 0x627   : > { %v4691_v62 = vpop.eup %4690  ;;  %4710 = vtanh.f32 %v3039_v59  ;;  %v3152_v63 = vpop.f32.mrb[160].mxu1  ;;  %v4064_v2 = vpack.c.bf16 %v4689_v58, %v4681_v43 }
 0x628   : > { %v3041_v1 = vpop.f32.mrb[161].mxu0  ;;  %v4693_v25 = vpop.eup %4692  ;;  %4712 = vtanh.f32 %v3152_v63  ;;  %v4046_v32 = vpack.c.bf16 %v4691_v62, %v4683_v45 }
 0x629   : > { %v3154_v3 = vpop.f32.mrb[161].mxu1  ;;  %v4695_v4 = vpop.eup %4694  ;;  %4714 = vtanh.f32 %v3041_v1  ;;  %v4062_v5 = vpack.c.bf16 %v4693_v25, %v4685_v49 }
 0x62a   : > { %v4697_v37 = vpop.eup %4696  ;;  %4716 = vtanh.f32 %v3154_v3  ;;  %4047 = vmatprep.subr.bf16.mxu0 %v4046_v32  ;;  %v3045_v6 = vpop.f32.mrb[162].mxu0 }
 0x62b   : > { %v4699_v46 = vpop.eup %4698  ;;  %4063 = vmatprep.subr.bf16.mxu1 %v4062_v5  ;;  %4718 = vtanh.f32 %v3045_v6  ;;  %v3158_v7 = vpop.f32.mrb[162].mxu1  ;;  %4049 = vmatpush1.bf16.msra.mxu0 %v4048_v60 }
 0x62c   : > { %v3047_v26 = vpop.f32.mrb[163].mxu0  ;;  %v4701_v8 = vpop.eup %4700  ;;  %4720 = vtanh.f32 %v3158_v7  ;;  %4065 = vmatpush1.bf16.msra.mxu1 %v4064_v2 }
 0x62d   : > { %v3160_v9 = vpop.f32.mrb[163].mxu1  ;;  %v4703_v10 = vpop.eup %4702  ;;  %4722 = vtanh.f32 %v3047_v26 }
 0x62e   : > { %v4705_v11 = vpop.eup %4704  ;;  %4724 = vtanh.f32 %v3160_v9  ;;  %v3051_v12 = vpop.f32.mrb[164].mxu0  ;;  %v4052_v13 = vpack.c.bf16 %v4703_v10, %v4695_v4 }
 0x62f   : > { %v4707_v14 = vpop.eup %4706  ;;  %4726 = vtanh.f32 %v3051_v12  ;;  %v3164_v15 = vpop.f32.mrb[164].mxu1  ;;  %v4068_v53 = vpack.c.bf16 %v4705_v11, %v4697_v37 }
 0x630   : > { %v3053_v52 = vpop.f32.mrb[165].mxu0  ;;  %v4709_v54 = vpop.eup %4708  ;;  %4728 = vtanh.f32 %v3164_v15  ;;  %v4050_v56 = vpack.c.bf16 %v4707_v14, %v4699_v46 }
 0x631   : > { %v3166_v55 = vpop.f32.mrb[165].mxu1  ;;  %v4711_v57 = vpop.eup %4710  ;;  %4730 = vtanh.f32 %v3053_v52  ;;  %v4066_v61 = vpack.c.bf16 %v4709_v54, %v4701_v8 }
 0x632   : > { %v4713_v16 = vpop.eup %4712  ;;  %4732 = vtanh.f32 %v3166_v55  ;;  %4051 = vmatprep.subr.bf16.mxu0 %v4050_v56  ;;  %v3057_v21 = vpop.f32.mrb[166].mxu0 }
 0x633   : > { %v4715_v17 = vpop.eup %4714  ;;  %4067 = vmatprep.subr.bf16.mxu1 %v4066_v61  ;;  %4734 = vtanh.f32 %v3057_v21  ;;  %v3170_v18 = vpop.f32.mrb[166].mxu1  ;;  %4053 = vmatpush1.bf16.msra.mxu0 %v4052_v13 }
 0x634   : > { %v3059_v19 = vpop.f32.mrb[167].mxu0  ;;  %v4717_v20 = vpop.eup %4716  ;;  %4736 = vtanh.f32 %v3170_v18  ;;  %4069 = vmatpush1.bf16.msra.mxu1 %v4068_v53 }
 0x635   : > { %v3172_v22 = vpop.f32.mrb[167].mxu1  ;;  %v4719_v23 = vpop.eup %4718  ;;  %4738 = vtanh.f32 %v3059_v19 }
 0x636   : > { %v4721_v24 = vpop.eup %4720  ;;  %4740 = vtanh.f32 %v3172_v22  ;;  %v4056_v27 = vpack.c.bf16 %v4719_v23, %v4711_v57 }
 0x637   : > { %v4723_v29 = vpop.eup %4722  ;;  %v4072_v30 = vpack.c.bf16 %v4721_v24, %v4713_v16 }
 0x638   : > { %v4725_v31 = vpop.eup %4724  ;;  %v4054_v33 = vpack.c.bf16 %v4723_v29, %v4715_v17 }
 0x639   : > { %v4727_v34 = vpop.eup %4726  ;;  %v4070_v35 = vpack.c.bf16 %v4725_v31, %v4717_v20 }
 0x63a   : > { %v4729_v36 = vpop.eup %4728  ;;  %4055 = vmatprep.subr.bf16.mxu0 %v4054_v33 }
 0x63b   : > { %v4731_v38 = vpop.eup %4730  ;;  %4071 = vmatprep.subr.bf16.mxu1 %v4070_v35  ;;  %4057 = vmatpush1.bf16.msra.mxu0 %v4056_v27 }
 0x63c   : > { %v4733_v39 = vpop.eup %4732  ;;  %4073 = vmatpush1.bf16.msra.mxu1 %v4072_v30 }
 0x63d   : > { %v4735_v40 = vpop.eup %4734 }
 0x63e   : > { %v4737_v0 = vpop.eup %4736  ;;  %v4060_v41 = vpack.c.bf16 %v4735_v40, %v4727_v34 }
 0x63f   : > { %v4739_v42 = vpop.eup %4738  ;;  %v4076_v43 = vpack.c.bf16 %v4737_v0, %v4729_v36 }
 0x640   : > { %v4741_v44 = vpop.eup %4740  ;;  %v4058_v45 = vpack.c.bf16 %v4739_v42, %v4731_v38 }
 0x641   : > { %v4074_v47 = vpack.c.bf16 %v4741_v44, %v4733_v39 }
 0x642   : > { %4059 = vmatprep.subr.bf16.mxu0 %v4058_v45 }
 0x643   : > { %4075 = vmatprep.subr.bf16.mxu1 %v4074_v47  ;;  %4061 = vmatpush1.bf16.msra.mxu0 %v4060_v41 }
 0x644   : > { %4077 = vmatpush1.bf16.msra.mxu1 %v4076_v43 }
 0x646   : > { %3766 = vmatmul.mubr.msk.f32.vlgmr.msra.gmra.mrb[170].mxu0 %vm2666_vm2, %v5585_v28 }
 0x647   : > { %3767 = vmatmul.mubr.msk.f32.vlgmr.msra.gmra.mrb[170].mxu1 %vm2666_vm2, %v5585_v28 }
 0x6d5   : > { %v3277_v48 = vpop.f32.mrb[168].mxu0 }
 0x6d6   : > { %v3348_v49 = vpop.f32.mrb[168].mxu1  ;;  %v3279_v50 = vpop.f32.mrb[169].mxu0 }
 0x6d7   : > { %v3499_v51 = vcombine.low %v3277_v48, %v3279_v50  ;;  %v3350_v58 = vpop.f32.mrb[169].mxu1 }
 0x6d8   : > { %v3500_v59 = vcombine.low %v3348_v49, %v3350_v58 }
 0x6d9   : > { %3503 = vst [vmem:[%s137_s25] sm:$0x77] %v3499_v51 }
 0x6da   : > { %3504 = vst [vmem:[%s137_s25 + $0x8] sm:$0x77] %v3500_v59 }
 0x719   : > { %v3419_v60 = vpop.f32.mrb[170].mxu0 }
 0x71a   : > { %v3490_v62 = vpop.f32.mrb[170].mxu1  ;;  %v3421_v63 = vpop.f32.mrb[171].mxu0 }
 0x71b   : > { %v3509_v1 = vcombine.low %v3419_v60, %v3421_v63  ;;  %v3492_v2 = vpop.f32.mrb[171].mxu1 }
 0x71c   : > { %v3510_v28 = vcombine.low %v3490_v62, %v3492_v2 }
 0x71d   : > { %3513 = vst [vmem:[%s137_s25 + $0x10] sm:$0x77] %v3509_v1 }
 0x71e   : > { %3514 = vst [vmem:[%s137_s25 + $0x18] sm:$0x77] %v3510_v28 }
 0x71f   : > { %4755 = shalt.err (!%p4752_p3)
}
 0x720   : > { %s4756_s7 = scalar_lea.hbm %s5602_s30, 512  ;;  %s4760_s16 = scalar_lea.hbm %s5646_s2, 2048 }
 0x721   : > { %p4757_p4 = scmp.ne.s32.totalorder %s5602_s30, %s4756_s7  ;;  %p4761_p9 = scmp.lt.u32.totalorder %s5602_s30, %s5646_s2 }
 0x722   : > { %p4762_p10 = scmp.lt.u32.totalorder %s4760_s16, %s4756_s7  ;;  %p4764_p12 = scmp.lt.u32.totalorder %s4756_s7, %s5602_s30 }
 0x723   : > { %p4758_p7 = pnand %p4757_p4, %p4861_p5 }
 0x724   : > { %p4763_p11 = por %p4762_p10, %p4761_p9 }
 0x725   : > { %p4759_p8 = pneg %p4758_p7 }
 0x726   : > { %p4765_p13 = por %p4764_p12, %p4763_p11 }
 0x728   : > { %p4766_p0 = pnand %p4765_p13, %p4759_p8 }
 0x72a   : > { %4769 = shalt.err (!%p4766_p0)
}
 0x72b   : > { %4078 = dma.vmem_to_hbm [thread:$0]  (%p4861_p5), %s5604_s27, 512, %s5602_s30, %s3516_s3  }
 0x72c PF: > { %p4084_p1 = scmp.ge.s32.totalorder %s4804_s12, 2  ;;  %s3542_s22 = sand.u32 1, %s4792_s9  }
 0x72d   : > { %s3543_s23 = scalar_lea.sflag [#allocation3], %s3542_s22 }
 0x72e   : > { %p4081_p2 = pnand %p4084_p1, %p4865_p6 }
 0x730   : > { %4787 = dma.done.wait (!%p4081_p2), %s3543_s23, 512  }
 0x731   : > { %4789 = vsyncadd (!%p4081_p2), %s3543_s23, 4294966784  ;;  %p12_p3 = scmp.ge.s32.totalorder %s4848_s15, 6   ;;  %s5649_s9 = smov %s4796_s10 }
 0x732   : > { %s5650_s10 = smov %s4800_s11  ;;  %s5651_s11 = smov %s4859_s18 }
 0x733   : > { %s5652_s12 = smov %s4848_s15  ;;  %14 = sbr.rel (!%p12_p3) target bundleno = 3 (0x3), region = 63 }
 0x73a   :  { %3548 = vsyncpa [#allocation3], 1 }
 0x73b   :  { %3550 = vsyncpa [#allocation3 + $0x1], 1 }

</bundles_post_ra>
